<compile_context>
chip_gen: v7x
topology: tpu7x:2x2x1
jax: 0.10.0
libtpu: 0.0.40
codegen_flags: <defaults>
</compile_context>

<pallas_src>
import jax
import jax.numpy as jnp
from jax import lax
from jax.experimental import pallas as pl
from jax.experimental.pallas import tpu as pltpu

# ---- "config" used by the PyTorch module (small synthetic sizes) ----
VOCAB_SIZE = 50
EMB_DIM = 32      # config.emb_dim
HIDDEN_DIM = 32   # config.hidden_dim
B = 2
T = 8


def _round_up(x, m):
    return ((x + m - 1) // m) * m


def _const_layout(emb_dim, hidden):
    """Row offsets of the packed constant slab (all 8-row aligned)."""
    r_wih = 0
    r_whh = r_wih + 2 * emb_dim
    r_bias = r_whh + 2 * hidden
    r_wht = r_bias + 8
    n_rows = r_wht + 2 * hidden
    return r_wih, r_whh, r_bias, r_wht, n_rows


# --------------------------------------------------------------------------
# Fused bidirectional-LSTM + W_h epilogue Pallas kernel
# --------------------------------------------------------------------------
def make_fused_bilstm_kernel(seq_len, batch_pad, hidden, emb_dim):
    T_, Bp, H, E = seq_len, batch_pad, hidden, emb_dim
    H2 = 2 * H
    G8 = 8 * H
    R_WIH, R_WHH, R_BIAS, R_WHT, _ = _const_layout(E, H)

    def kernel(x_ref, mask_ref, const_ref, out_ref, hc_ref, gx_sc, out_sc):
        # x_ref:    [T*Bp, 2E]  time-major; cols[:E]=emb[t], cols[E:]=emb[T-1-t]
        # mask_ref: [T*Bp, 4H]  f32 0/1; cols[:2H] = per-iteration hold mask
        #                                cols[2H:] = per-time output validity mask
        # const_ref:[200, 8H]   packed (wih | whh | bias | Wh_T)
        # out_ref:  [T*Bp, 4H]  (encoder_outputs | encoder_feature), time-major
        # hc_ref:   [Bp, 4H]    (h_f | h_b | c_f | c_b)
        # gx_sc:    [T*Bp, 8H]  hoisted input-projection gates
        # out_sc:   [T*Bp, 2H]  per-step hidden outputs (fwd lanes | bwd lanes)

        wih = const_ref[R_WIH:R_WIH + 2 * E, :]            # [2E, 8H]
        whh = const_ref[R_WHH:R_WHH + 2 * H, :]            # [2H, 8H] block-diagonal
        bias = const_ref[R_BIAS:R_BIAS + 1, :]             # [1, 8H]
        whT = const_ref[R_WHT:R_WHT + 2 * H, 0:2 * H]      # [2H, 2H]

        # ---- hoisted input projection: one matmul + one bias broadcast ----
        gx_sc[...] = jnp.dot(x_ref[...], wih,
                             preferred_element_type=jnp.float32) + bias

        # ---- loop-invariant activation masks (one full-vreg EUP pass per step) ----
        # sigmoid(x) = 0.5*tanh(0.5*x)+0.5 on i/f/o lanes, plain tanh on g lanes.
        lane = lax.broadcasted_iota(jnp.int32, (1, G8), 1)
        is_g = jnp.logical_and(lane >= 4 * H, lane < 6 * H)
        act_scale = jnp.where(is_g, 1.0, 0.5).astype(jnp.float32)
        act_off = jnp.where(is_g, 0.0, 0.5).astype(jnp.float32)

        h0 = jnp.zeros((Bp, H2), jnp.float32)              # lanes [:H]=fwd, [H:]=bwd
        c0 = jnp.zeros((Bp, H2), jnp.float32)

        def step(i, carry):
            h, c = carry                                   # register-carried state
            tb = T_ - 1 - i                                # backward-direction time
            base_i = pl.multiple_of(i * Bp, Bp)
            base_b = pl.multiple_of(tb * Bp, Bp)

            # single recurrent matmul for both directions (block-diagonal weights)
            rec = jnp.dot(h, whh, preferred_element_type=jnp.float32)   # [Bp, 8H]
            gates = rec + gx_sc[pl.ds(base_i, Bp)]
            a = jnp.tanh(gates * act_scale) * act_scale + act_off

            i_g = a[:, 0 * H2:1 * H2]                      # each [Bp, 2H] = both dirs
            f_g = a[:, 1 * H2:2 * H2]
            g_g = a[:, 2 * H2:3 * H2]
            o_g = a[:, 3 * H2:4 * H2]
            c_new = f_g * c + i_g * g_g
            h_new = o_g * jnp.tanh(c_new)

            # hold state past seq_len (mask precomputed, off the recurrent chain)
            m = mask_ref[pl.ds(base_i, Bp), pl.ds(0, H2)] > 0.5
            c = jnp.where(m, c_new, c)
            h = jnp.where(m, h_new, h)

            # store unmasked hidden; zeroing happens lane-densely in the epilogue
            out_sc[pl.ds(base_i, Bp), pl.ds(0, H)] = h_new[:, :H]
            out_sc[pl.ds(base_b, Bp), pl.ds(H, H)] = h_new[:, H:]
            return h, c

        h_fin, c_fin = lax.fori_loop(0, T_, step, (h0, c0), unroll=True)

        # ---- epilogue: mask, fused W_h matmul, 128-lane dense writebacks ----
        enc = out_sc[...] * mask_ref[:, H2:2 * H2]          # pad_packed -> exact zeros
        feat = jnp.dot(enc, whT, preferred_element_type=jnp.float32)
        out_ref[...] = jnp.concatenate([enc, feat], axis=-1)    # [T*Bp, 128]
        hc_ref[...] = jnp.concatenate([h_fin, c_fin], axis=-1)  # [Bp, 128]

    return kernel


def run_encoder_kernel(x2d, mask2d, consts, *, seq_len, batch_pad, hidden, emb_dim):
    TB = seq_len * batch_pad
    H4 = 4 * hidden
    kernel = make_fused_bilstm_kernel(seq_len, batch_pad, hidden, emb_dim)
    out_shapes = (
        jax.ShapeDtypeStruct((TB, H4), jnp.float32),          # (enc | feat), time-major
        jax.ShapeDtypeStruct((batch_pad, H4), jnp.float32),   # (h_f|h_b|c_f|c_b)
    )
    return pl.pallas_call(
        kernel,
        out_shape=out_shapes,
        scratch_shapes=[
            pltpu.VMEM((TB, 8 * hidden), jnp.float32),   # hoisted input-proj gates
            pltpu.VMEM((TB, 2 * hidden), jnp.float32),   # per-step hidden outputs
        ],
    )(x2d, mask2d, consts)


# --------------------------------------------------------------------------
# Encoder forward
# --------------------------------------------------------------------------
def encoder_forward(params, input_ids, seq_lens):
    H, E = HIDDEN_DIM, EMB_DIM
    B_, T_ = input_ids.shape
    Bp = max(8, _round_up(B_, 8))   # full f32 sublane tile

    # TODO(synk): embedding gather (and the pack_padded bookkeeping) stays as cheap XLA
    # glue; an in-kernel gather via a VMEM-resident table is possible but not worth it here.
    emb = jnp.take(params['embedding'], input_ids, axis=0).astype(jnp.float32)   # [B,T,E]
    emb_p = jnp.zeros((Bp, T_, E), jnp.float32).at[:B_].set(emb)
    x_tm = jnp.transpose(emb_p, (1, 0, 2))                    # [T, Bp, E] time-major
    # lower E lanes: emb[t] (fwd direction); upper E lanes: emb[T-1-t] (bwd direction)
    x2d = jnp.concatenate([x_tm, x_tm[::-1]], axis=-1).reshape(T_ * Bp, 2 * E)

    # --- hoisted masks (hold mask per iteration | output validity per time) ---
    lens_p = jnp.zeros((Bp,), jnp.int32).at[:B_].set(seq_lens.astype(jnp.int32))
    t_idx = jnp.arange(T_, dtype=jnp.int32)[:, None, None]                 # [T,1,1]
    vf = lens_p[None, :, None] > t_idx                                     # [T,Bp,1]
    vb = lens_p[None, :, None] > (T_ - 1 - t_idx)
    hold = jnp.concatenate([jnp.broadcast_to(vf, (T_, Bp, H)),
                            jnp.broadcast_to(vb, (T_, Bp, H))], axis=-1)   # [T,Bp,2H]
    outm = jnp.broadcast_to(vf, (T_, Bp, 2 * H))
    mask2d = jnp.concatenate([hold, outm], axis=-1).reshape(
        T_ * Bp, 4 * H).astype(jnp.float32)

    # --- packed constants with interleaved gate lane layout ---
    def interleave(wf, wb):
        # (i_f|i_b | f_f|f_b | g_f|g_b | o_f|o_b), PyTorch gate order i,f,g,o
        parts = []
        for k in range(4):
            parts.append(wf[..., k * H:(k + 1) * H])
            parts.append(wb[..., k * H:(k + 1) * H])
        return jnp.concatenate(parts, axis=-1)

    zE = jnp.zeros((E, 4 * H), jnp.float32)
    zH = jnp.zeros((H, 4 * H), jnp.float32)
    wih_cat = interleave(jnp.concatenate([params['wih_f'], zE], axis=0),
                         jnp.concatenate([zE, params['wih_b']], axis=0))   # [2E, 8H]
    whh_cat = interleave(jnp.concatenate([params['whh_f'], zH], axis=0),
                         jnp.concatenate([zH, params['whh_b']], axis=0))   # [2H, 8H]
    bias_cat = interleave(params['b_f'], params['b_b'])                    # [1, 8H]

    R_WIH, R_WHH, R_BIAS, R_WHT, n_rows = _const_layout(E, H)
    consts = jnp.zeros((n_rows, 8 * H), jnp.float32)
    consts = consts.at[R_WIH:R_WIH + 2 * E, :].set(wih_cat)
    consts = consts.at[R_WHH:R_WHH + 2 * H, :].set(whh_cat)
    consts = consts.at[R_BIAS:R_BIAS + 1, :].set(bias_cat)
    consts = consts.at[R_WHT:R_WHT + 2 * H, 0:2 * H].set(params['Wh_T'])

    out2d, hc = run_encoder_kernel(x2d, mask2d, consts,
                                   seq_len=T_, batch_pad=Bp, hidden=H, emb_dim=E)

    enc_tm = out2d[:, :2 * H].reshape(T_, Bp, 2 * H)
    feat_tm = out2d[:, 2 * H:].reshape(T_, Bp, 2 * H)
    encoder_outputs = jnp.transpose(enc_tm, (1, 0, 2))[:B_]                    # [B,T,2H]
    encoder_feature = jnp.transpose(feat_tm, (1, 0, 2))[:B_].reshape(B_ * T_, 2 * H)

    h_n = jnp.stack([hc[:B_, 0:H], hc[:B_, H:2 * H]], axis=0)                  # [2,B,H]
    c_n = jnp.stack([hc[:B_, 2 * H:3 * H], hc[:B_, 3 * H:4 * H]], axis=0)
    return encoder_outputs, encoder_feature, (h_n, c_n)


# --------------------------------------------------------------------------
# Pure-JAX reference (lax.scan) for a correctness sanity check
# --------------------------------------------------------------------------
def ref_encoder(params, input_ids, seq_lens):
    emb = jnp.take(params['embedding'], input_ids, axis=0)            # [B, T, E]
    lens = seq_lens.astype(jnp.int32)
    B_, T_, _ = emb.shape
    H = HIDDEN_DIM

    def run_dir(wihT, whhT, b, reverse):
        h0 = jnp.zeros((B_, H), jnp.float32)
        c0 = jnp.zeros((B_, H), jnp.float32)
        ts = jnp.arange(T_)
        if reverse:
            ts = ts[::-1]

        def step(carry, t):
            h, c = carry
            x_t = emb[:, t, :]
            gates = jnp.dot(x_t, wihT) + jnp.dot(h, whhT) + b
            i_g = jax.nn.sigmoid(gates[:, :H])
            f_g = jax.nn.sigmoid(gates[:, H:2 * H])
            g_g = jnp.tanh(gates[:, 2 * H:3 * H])
            o_g = jax.nn.sigmoid(gates[:, 3 * H:4 * H])
            c_new = f_g * c + i_g * g_g
            h_new = o_g * jnp.tanh(c_new)
            mask = lens[:, None] > t
            c = jnp.where(mask, c_new, c)
            h = jnp.where(mask, h_new, h)
            out_t = jnp.where(mask, h, 0.0)
            return (h, c), out_t

        (hN, cN), outs = lax.scan(step, (h0, c0), ts)
        if reverse:
            outs = outs[::-1]
        return jnp.transpose(outs, (1, 0, 2)), hN, cN

    out_f, hf, cf = run_dir(params['wih_f'], params['whh_f'], params['b_f'], False)
    out_b, hb, cb = run_dir(params['wih_b'], params['whh_b'], params['b_b'], True)
    enc_out = jnp.concatenate([out_f, out_b], axis=-1)
    feat = jnp.dot(enc_out.reshape(-1, 2 * HIDDEN_DIM), params['Wh_T'])
    return enc_out, feat, (jnp.stack([hf, hb]), jnp.stack([cf, cb]))


# --------------------------------------------------------------------------
# Deterministic parameter init (shapes per Encoder.__init__)
# --------------------------------------------------------------------------
def init_params(key):
    ks = jax.random.split(key, 8)
    H, E = HIDDEN_DIM, EMB_DIM

    def nrm(k, shape, std=0.1):
        return (std * jax.random.normal(k, shape)).astype(jnp.float32)

    return {
        # nn.Embedding(vocab_size, emb_dim)
        'embedding': nrm(ks[0], (VOCAB_SIZE, E)),
        # bidirectional LSTM weights, stored pre-transposed ([E,4H]/[H,4H]),
        # combined bias b_ih + b_hh as [1, 4H], PyTorch gate order i,f,g,o
        'wih_f': nrm(ks[1], (E, 4 * H)),
        'whh_f': nrm(ks[2], (H, 4 * H)),
        'b_f':   nrm(ks[3], (1, 4 * H)),
        'wih_b': nrm(ks[4], (E, 4 * H)),
        'whh_b': nrm(ks[5], (H, 4 * H)),
        'b_b':   nrm(ks[6], (1, 4 * H)),
        # nn.Linear(2H, 2H, bias=False): stored as weight.T -> [2H, 2H]
        'Wh_T':  nrm(ks[7], (2 * H, 2 * H)),
    }


if __name__ == "__main__":
    key = jax.random.PRNGKey(0)
    k_param, k_ids = jax.random.split(key)

    params = init_params(k_param)
    input_ids = jax.random.randint(k_ids, (B, T), 0, VOCAB_SIZE, dtype=jnp.int32)
    # pack_padded_sequence requires descending lengths; max length == T so the
    # padded output length matches pad_packed_sequence's.
    seq_lens = jnp.array([T, 5], dtype=jnp.int32)

    fwd = jax.jit(encoder_forward)
    encoder_outputs, encoder_feature, (h_n, c_n) = fwd(params, input_ids, seq_lens)
    jax.block_until_ready((encoder_outputs, encoder_feature, h_n, c_n))

    # ---- sanity checks against pure-JAX reference ----
    r_out, r_feat, (r_h, r_c) = jax.jit(ref_encoder)(params, input_ids, seq_lens)

    assert encoder_outputs.shape == (B, T, 2 * HIDDEN_DIM)
    assert encoder_feature.shape == (B * T, 2 * HIDDEN_DIM)
    assert h_n.shape == (2, B, HIDDEN_DIM) and c_n.shape == (2, B, HIDDEN_DIM)
    # padded positions (batch 1, t >= 5) must be exactly zero, as in pad_packed_sequence
    assert bool(jnp.all(encoder_outputs[1, 5:, :] == 0.0))

    import numpy as np
    np.testing.assert_allclose(np.asarray(encoder_outputs), np.asarray(r_out),
                               rtol=1e-2, atol=5e-3)
    np.testing.assert_allclose(np.asarray(encoder_feature), np.asarray(r_feat),
                               rtol=1e-2, atol=5e-3)
    np.testing.assert_allclose(np.asarray(h_n), np.asarray(r_h), rtol=1e-2, atol=5e-3)
    np.testing.assert_allclose(np.asarray(c_n), np.asarray(r_c), rtol=1e-2, atol=5e-3)

    print("KERNEL_OK")
</pallas_src>

<mosaic_0001>
module attributes {stable_mosaic.version = 11 : i64} {
  func.func @kernel(%arg0: memref<64x64xf32, #tpu.memory_space<vmem>>, %arg1: memref<64x128xf32, #tpu.memory_space<vmem>>, %arg2: memref<200x256xf32, #tpu.memory_space<vmem>>, %arg3: memref<64x128xf32, #tpu.memory_space<vmem>>, %arg4: memref<8x128xf32, #tpu.memory_space<vmem>>, %arg5: memref<64x256xf32, #tpu.memory_space<vmem>>, %arg6: memref<64x64xf32, #tpu.memory_space<vmem>>) attributes {dimension_semantics = [], scalar_prefetch = 0 : i64, scratch_operands = 2 : i64, tpu.core_type = #tpu.core_type<tc>} {
    %c0 = arith.constant 0 : index
    %c0_0 = arith.constant 0 : index
    %0 = vector.load %arg2[%c0, %c0_0] : memref<200x256xf32, #tpu.memory_space<vmem>>, vector<64x256xf32>
    %c64 = arith.constant 64 : index
    %c0_1 = arith.constant 0 : index
    %1 = vector.load %arg2[%c64, %c0_1] : memref<200x256xf32, #tpu.memory_space<vmem>>, vector<64x256xf32>
    %c128 = arith.constant 128 : index
    %c0_2 = arith.constant 0 : index
    %2 = vector.load %arg2[%c128, %c0_2] : memref<200x256xf32, #tpu.memory_space<vmem>>, vector<1x256xf32>
    %c136 = arith.constant 136 : index
    %c0_3 = arith.constant 0 : index
    %3 = vector.load %arg2[%c136, %c0_3] : memref<200x256xf32, #tpu.memory_space<vmem>>, vector<64x64xf32>
    %c0_4 = arith.constant 0 : index
    %c0_5 = arith.constant 0 : index
    %4 = vector.load %arg0[%c0_4, %c0_5] : memref<64x64xf32, #tpu.memory_space<vmem>>, vector<64x64xf32>
    %cst = arith.constant dense<0.000000e+00> : vector<64x256xf32>
    %5 = tpu.matmul %4, %0, %cst {dimension_numbers = #tpu.dot_dimension_numbers<[1], [0], [0], [1], [0, 0, 1, 1], [], []>} : vector<64x64xf32>, vector<64x256xf32>, vector<64x256xf32> -> vector<64x256xf32>
    %6 = vector.broadcast %2 : vector<1x256xf32> to vector<64x256xf32>
    %7 = arith.addf %5, %6 : vector<64x256xf32>
    %c0_6 = arith.constant 0 : index
    %c0_7 = arith.constant 0 : index
    %8 = vector.load %arg5[%c0_6, %c0_7] : memref<64x256xf32, #tpu.memory_space<vmem>>, vector<64x256xf32>
    tpu.vector_store %arg5[%c0_6, %c0_7], %7 {strides = array<i32>} : memref<64x256xf32, #tpu.memory_space<vmem>>, vector<64x256xf32>,
    %9 = tpu.iota {dimensions = array<i32: 1>} : vector<1x256xi32>
    %c128_i32 = arith.constant 128 : i32
    %10 = vector.broadcast %c128_i32 : i32 to vector<1x256xi32>
    %11 = arith.cmpi sge, %9, %10 : vector<1x256xi32>
    %c192_i32 = arith.constant 192 : i32
    %12 = vector.broadcast %c192_i32 : i32 to vector<1x256xi32>
    %13 = arith.cmpi slt, %9, %12 : vector<1x256xi32>
    %14 = arith.andi %11, %13 : vector<1x256xi1>
    %cst_8 = arith.constant 1.000000e+00 : f32
    %cst_9 = arith.constant 5.000000e-01 : f32
    %15 = vector.broadcast %cst_8 : f32 to vector<1x256xf32>
    %16 = vector.broadcast %cst_9 : f32 to vector<1x256xf32>
    %17 = arith.select %14, %15, %16 : vector<1x256xi1>, vector<1x256xf32>
    %cst_10 = arith.constant 0.000000e+00 : f32
    %cst_11 = arith.constant 5.000000e-01 : f32
    %18 = vector.broadcast %cst_10 : f32 to vector<1x256xf32>
    %19 = vector.broadcast %cst_11 : f32 to vector<1x256xf32>
    %20 = arith.select %14, %18, %19 : vector<1x256xi1>, vector<1x256xf32>
    %cst_12 = arith.constant 0.000000e+00 : f32
    %21 = vector.broadcast %cst_12 : f32 to vector<8x64xf32>
    %cst_13 = arith.constant 0.000000e+00 : f32
    %22 = vector.broadcast %cst_13 : f32 to vector<8x64xf32>
    %c0_i32 = arith.constant 0 : i32
    %c7_i32 = arith.constant 7 : i32
    %23 = arith.subi %c7_i32, %c0_i32 : i32
    %c8_i32 = arith.constant 8 : i32
    %24 = arith.muli %c0_i32, %c8_i32 : i32
    %25 = tpu.assume_multiple %24, 8 : i32
    %c8_i32_14 = arith.constant 8 : i32
    %26 = arith.muli %23, %c8_i32_14 : i32
    %27 = tpu.assume_multiple %26, 8 : i32
    %cst_15 = arith.constant dense<0.000000e+00> : vector<8x256xf32>
    %28 = tpu.matmul %21, %1, %cst_15 {dimension_numbers = #tpu.dot_dimension_numbers<[1], [0], [0], [1], [0, 0, 1, 1], [], []>} : vector<8x64xf32>, vector<64x256xf32>, vector<8x256xf32> -> vector<8x256xf32>
    %29 = arith.index_cast %25 : i32 to index
    %c0_16 = arith.constant 0 : index
    %30 = vector.load %arg5[%29, %c0_16] : memref<64x256xf32, #tpu.memory_space<vmem>>, vector<8x256xf32>
    %31 = arith.addf %28, %30 : vector<8x256xf32>
    %32 = vector.broadcast %17 : vector<1x256xf32> to vector<8x256xf32>
    %33 = arith.mulf %31, %32 : vector<8x256xf32>
    %34 = math.tanh %33 : vector<8x256xf32>
    %35 = vector.broadcast %17 : vector<1x256xf32> to vector<8x256xf32>
    %36 = arith.mulf %34, %35 : vector<8x256xf32>
    %37 = vector.broadcast %20 : vector<1x256xf32> to vector<8x256xf32>
    %38 = arith.addf %36, %37 : vector<8x256xf32>
    %39 = vector.extract_strided_slice %38 {offsets = [0, 0], sizes = [8, 64], strides = [1, 1]} : vector<8x256xf32> to vector<8x64xf32>
    %40 = vector.extract_strided_slice %38 {offsets = [0, 64], sizes = [8, 64], strides = [1, 1]} : vector<8x256xf32> to vector<8x64xf32>
    %41 = vector.extract_strided_slice %38 {offsets = [0, 128], sizes = [8, 64], strides = [1, 1]} : vector<8x256xf32> to vector<8x64xf32>
    %42 = vector.extract_strided_slice %38 {offsets = [0, 192], sizes = [8, 64], strides = [1, 1]} : vector<8x256xf32> to vector<8x64xf32>
    %43 = arith.mulf %40, %22 : vector<8x64xf32>
    %44 = arith.mulf %39, %41 : vector<8x64xf32>
    %45 = arith.addf %43, %44 : vector<8x64xf32>
    %46 = math.tanh %45 : vector<8x64xf32>
    %47 = arith.mulf %42, %46 : vector<8x64xf32>
    %48 = arith.index_cast %25 : i32 to index
    %c0_17 = arith.constant 0 : index
    %49 = vector.load %arg1[%48, %c0_17] : memref<64x128xf32, #tpu.memory_space<vmem>>, vector<8x64xf32>
    %cst_18 = arith.constant 5.000000e-01 : f32
    %50 = vector.broadcast %cst_18 : f32 to vector<8x64xf32>
    %51 = arith.cmpf ogt, %49, %50 : vector<8x64xf32>
    %52 = arith.select %51, %45, %22 : vector<8x64xi1>, vector<8x64xf32>
    %53 = arith.select %51, %47, %21 : vector<8x64xi1>, vector<8x64xf32>
    %54 = vector.extract_strided_slice %47 {offsets = [0, 0], sizes = [8, 32], strides = [1, 1]} : vector<8x64xf32> to vector<8x32xf32>
    %55 = arith.index_cast %25 : i32 to index
    %c0_19 = arith.constant 0 : index
    %56 = vector.load %arg6[%55, %c0_19] : memref<64x64xf32, #tpu.memory_space<vmem>>, vector<8x32xf32>
    tpu.vector_store %arg6[%55, %c0_19], %54 {strides = array<i32>} : memref<64x64xf32, #tpu.memory_space<vmem>>, vector<8x32xf32>,
    %57 = vector.extract_strided_slice %47 {offsets = [0, 32], sizes = [8, 32], strides = [1, 1]} : vector<8x64xf32> to vector<8x32xf32>
    %58 = arith.index_cast %27 : i32 to index
    %c32 = arith.constant 32 : index
    %59 = vector.load %arg6[%58, %c32] : memref<64x64xf32, #tpu.memory_space<vmem>>, vector<8x32xf32>
    tpu.vector_store %arg6[%58, %c32], %57 {strides = array<i32>} : memref<64x64xf32, #tpu.memory_space<vmem>>, vector<8x32xf32>,
    %c1_i32 = arith.constant 1 : i32
    %c7_i32_20 = arith.constant 7 : i32
    %60 = arith.subi %c7_i32_20, %c1_i32 : i32
    %c8_i32_21 = arith.constant 8 : i32
    %61 = arith.muli %c1_i32, %c8_i32_21 : i32
    %62 = tpu.assume_multiple %61, 8 : i32
    %c8_i32_22 = arith.constant 8 : i32
    %63 = arith.muli %60, %c8_i32_22 : i32
    %64 = tpu.assume_multiple %63, 8 : i32
    %cst_23 = arith.constant dense<0.000000e+00> : vector<8x256xf32>
    %65 = tpu.matmul %53, %1, %cst_23 {dimension_numbers = #tpu.dot_dimension_numbers<[1], [0], [0], [1], [0, 0, 1, 1], [], []>} : vector<8x64xf32>, vector<64x256xf32>, vector<8x256xf32> -> vector<8x256xf32>
    %66 = arith.index_cast %62 : i32 to index
    %c0_24 = arith.constant 0 : index
    %67 = vector.load %arg5[%66, %c0_24] : memref<64x256xf32, #tpu.memory_space<vmem>>, vector<8x256xf32>
    %68 = arith.addf %65, %67 : vector<8x256xf32>
    %69 = vector.broadcast %17 : vector<1x256xf32> to vector<8x256xf32>
    %70 = arith.mulf %68, %69 : vector<8x256xf32>
    %71 = math.tanh %70 : vector<8x256xf32>
    %72 = vector.broadcast %17 : vector<1x256xf32> to vector<8x256xf32>
    %73 = arith.mulf %71, %72 : vector<8x256xf32>
    %74 = vector.broadcast %20 : vector<1x256xf32> to vector<8x256xf32>
    %75 = arith.addf %73, %74 : vector<8x256xf32>
    %76 = vector.extract_strided_slice %75 {offsets = [0, 0], sizes = [8, 64], strides = [1, 1]} : vector<8x256xf32> to vector<8x64xf32>
    %77 = vector.extract_strided_slice %75 {offsets = [0, 64], sizes = [8, 64], strides = [1, 1]} : vector<8x256xf32> to vector<8x64xf32>
    %78 = vector.extract_strided_slice %75 {offsets = [0, 128], sizes = [8, 64], strides = [1, 1]} : vector<8x256xf32> to vector<8x64xf32>
    %79 = vector.extract_strided_slice %75 {offsets = [0, 192], sizes = [8, 64], strides = [1, 1]} : vector<8x256xf32> to vector<8x64xf32>
    %80 = arith.mulf %77, %52 : vector<8x64xf32>
    %81 = arith.mulf %76, %78 : vector<8x64xf32>
    %82 = arith.addf %80, %81 : vector<8x64xf32>
    %83 = math.tanh %82 : vector<8x64xf32>
    %84 = arith.mulf %79, %83 : vector<8x64xf32>
    %85 = arith.index_cast %62 : i32 to index
    %c0_25 = arith.constant 0 : index
    %86 = vector.load %arg1[%85, %c0_25] : memref<64x128xf32, #tpu.memory_space<vmem>>, vector<8x64xf32>
    %cst_26 = arith.constant 5.000000e-01 : f32
    %87 = vector.broadcast %cst_26 : f32 to vector<8x64xf32>
    %88 = arith.cmpf ogt, %86, %87 : vector<8x64xf32>
    %89 = arith.select %88, %82, %52 : vector<8x64xi1>, vector<8x64xf32>
    %90 = arith.select %88, %84, %53 : vector<8x64xi1>, vector<8x64xf32>
    %91 = vector.extract_strided_slice %84 {offsets = [0, 0], sizes = [8, 32], strides = [1, 1]} : vector<8x64xf32> to vector<8x32xf32>
    %92 = arith.index_cast %62 : i32 to index
    %c0_27 = arith.constant 0 : index
    %93 = vector.load %arg6[%92, %c0_27] : memref<64x64xf32, #tpu.memory_space<vmem>>, vector<8x32xf32>
    tpu.vector_store %arg6[%92, %c0_27], %91 {strides = array<i32>} : memref<64x64xf32, #tpu.memory_space<vmem>>, vector<8x32xf32>,
    %94 = vector.extract_strided_slice %84 {offsets = [0, 32], sizes = [8, 32], strides = [1, 1]} : vector<8x64xf32> to vector<8x32xf32>
    %95 = arith.index_cast %64 : i32 to index
    %c32_28 = arith.constant 32 : index
    %96 = vector.load %arg6[%95, %c32_28] : memref<64x64xf32, #tpu.memory_space<vmem>>, vector<8x32xf32>
    tpu.vector_store %arg6[%95, %c32_28], %94 {strides = array<i32>} : memref<64x64xf32, #tpu.memory_space<vmem>>, vector<8x32xf32>,
    %c2_i32 = arith.constant 2 : i32
    %c7_i32_29 = arith.constant 7 : i32
    %97 = arith.subi %c7_i32_29, %c2_i32 : i32
    %c8_i32_30 = arith.constant 8 : i32
    %98 = arith.muli %c2_i32, %c8_i32_30 : i32
    %99 = tpu.assume_multiple %98, 8 : i32
    %c8_i32_31 = arith.constant 8 : i32
    %100 = arith.muli %97, %c8_i32_31 : i32
    %101 = tpu.assume_multiple %100, 8 : i32
    %cst_32 = arith.constant dense<0.000000e+00> : vector<8x256xf32>
    %102 = tpu.matmul %90, %1, %cst_32 {dimension_numbers = #tpu.dot_dimension_numbers<[1], [0], [0], [1], [0, 0, 1, 1], [], []>} : vector<8x64xf32>, vector<64x256xf32>, vector<8x256xf32> -> vector<8x256xf32>
    %103 = arith.index_cast %99 : i32 to index
    %c0_33 = arith.constant 0 : index
    %104 = vector.load %arg5[%103, %c0_33] : memref<64x256xf32, #tpu.memory_space<vmem>>, vector<8x256xf32>
    %105 = arith.addf %102, %104 : vector<8x256xf32>
    %106 = vector.broadcast %17 : vector<1x256xf32> to vector<8x256xf32>
    %107 = arith.mulf %105, %106 : vector<8x256xf32>
    %108 = math.tanh %107 : vector<8x256xf32>
    %109 = vector.broadcast %17 : vector<1x256xf32> to vector<8x256xf32>
    %110 = arith.mulf %108, %109 : vector<8x256xf32>
    %111 = vector.broadcast %20 : vector<1x256xf32> to vector<8x256xf32>
    %112 = arith.addf %110, %111 : vector<8x256xf32>
    %113 = vector.extract_strided_slice %112 {offsets = [0, 0], sizes = [8, 64], strides = [1, 1]} : vector<8x256xf32> to vector<8x64xf32>
    %114 = vector.extract_strided_slice %112 {offsets = [0, 64], sizes = [8, 64], strides = [1, 1]} : vector<8x256xf32> to vector<8x64xf32>
    %115 = vector.extract_strided_slice %112 {offsets = [0, 128], sizes = [8, 64], strides = [1, 1]} : vector<8x256xf32> to vector<8x64xf32>
    %116 = vector.extract_strided_slice %112 {offsets = [0, 192], sizes = [8, 64], strides = [1, 1]} : vector<8x256xf32> to vector<8x64xf32>
    %117 = arith.mulf %114, %89 : vector<8x64xf32>
    %118 = arith.mulf %113, %115 : vector<8x64xf32>
    %119 = arith.addf %117, %118 : vector<8x64xf32>
    %120 = math.tanh %119 : vector<8x64xf32>
    %121 = arith.mulf %116, %120 : vector<8x64xf32>
    %122 = arith.index_cast %99 : i32 to index
    %c0_34 = arith.constant 0 : index
    %123 = vector.load %arg1[%122, %c0_34] : memref<64x128xf32, #tpu.memory_space<vmem>>, vector<8x64xf32>
    %cst_35 = arith.constant 5.000000e-01 : f32
    %124 = vector.broadcast %cst_35 : f32 to vector<8x64xf32>
    %125 = arith.cmpf ogt, %123, %124 : vector<8x64xf32>
    %126 = arith.select %125, %119, %89 : vector<8x64xi1>, vector<8x64xf32>
    %127 = arith.select %125, %121, %90 : vector<8x64xi1>, vector<8x64xf32>
    %128 = vector.extract_strided_slice %121 {offsets = [0, 0], sizes = [8, 32], strides = [1, 1]} : vector<8x64xf32> to vector<8x32xf32>
    %129 = arith.index_cast %99 : i32 to index
    %c0_36 = arith.constant 0 : index
    %130 = vector.load %arg6[%129, %c0_36] : memref<64x64xf32, #tpu.memory_space<vmem>>, vector<8x32xf32>
    tpu.vector_store %arg6[%129, %c0_36], %128 {strides = array<i32>} : memref<64x64xf32, #tpu.memory_space<vmem>>, vector<8x32xf32>,
    %131 = vector.extract_strided_slice %121 {offsets = [0, 32], sizes = [8, 32], strides = [1, 1]} : vector<8x64xf32> to vector<8x32xf32>
    %132 = arith.index_cast %101 : i32 to index
    %c32_37 = arith.constant 32 : index
    %133 = vector.load %arg6[%132, %c32_37] : memref<64x64xf32, #tpu.memory_space<vmem>>, vector<8x32xf32>
    tpu.vector_store %arg6[%132, %c32_37], %131 {strides = array<i32>} : memref<64x64xf32, #tpu.memory_space<vmem>>, vector<8x32xf32>,
    %c3_i32 = arith.constant 3 : i32
    %c7_i32_38 = arith.constant 7 : i32
    %134 = arith.subi %c7_i32_38, %c3_i32 : i32
    %c8_i32_39 = arith.constant 8 : i32
    %135 = arith.muli %c3_i32, %c8_i32_39 : i32
    %136 = tpu.assume_multiple %135, 8 : i32
    %c8_i32_40 = arith.constant 8 : i32
    %137 = arith.muli %134, %c8_i32_40 : i32
    %138 = tpu.assume_multiple %137, 8 : i32
    %cst_41 = arith.constant dense<0.000000e+00> : vector<8x256xf32>
    %139 = tpu.matmul %127, %1, %cst_41 {dimension_numbers = #tpu.dot_dimension_numbers<[1], [0], [0], [1], [0, 0, 1, 1], [], []>} : vector<8x64xf32>, vector<64x256xf32>, vector<8x256xf32> -> vector<8x256xf32>
    %140 = arith.index_cast %136 : i32 to index
    %c0_42 = arith.constant 0 : index
    %141 = vector.load %arg5[%140, %c0_42] : memref<64x256xf32, #tpu.memory_space<vmem>>, vector<8x256xf32>
    %142 = arith.addf %139, %141 : vector<8x256xf32>
    %143 = vector.broadcast %17 : vector<1x256xf32> to vector<8x256xf32>
    %144 = arith.mulf %142, %143 : vector<8x256xf32>
    %145 = math.tanh %144 : vector<8x256xf32>
    %146 = vector.broadcast %17 : vector<1x256xf32> to vector<8x256xf32>
    %147 = arith.mulf %145, %146 : vector<8x256xf32>
    %148 = vector.broadcast %20 : vector<1x256xf32> to vector<8x256xf32>
    %149 = arith.addf %147, %148 : vector<8x256xf32>
    %150 = vector.extract_strided_slice %149 {offsets = [0, 0], sizes = [8, 64], strides = [1, 1]} : vector<8x256xf32> to vector<8x64xf32>
    %151 = vector.extract_strided_slice %149 {offsets = [0, 64], sizes = [8, 64], strides = [1, 1]} : vector<8x256xf32> to vector<8x64xf32>
    %152 = vector.extract_strided_slice %149 {offsets = [0, 128], sizes = [8, 64], strides = [1, 1]} : vector<8x256xf32> to vector<8x64xf32>
    %153 = vector.extract_strided_slice %149 {offsets = [0, 192], sizes = [8, 64], strides = [1, 1]} : vector<8x256xf32> to vector<8x64xf32>
    %154 = arith.mulf %151, %126 : vector<8x64xf32>
    %155 = arith.mulf %150, %152 : vector<8x64xf32>
    %156 = arith.addf %154, %155 : vector<8x64xf32>
    %157 = math.tanh %156 : vector<8x64xf32>
    %158 = arith.mulf %153, %157 : vector<8x64xf32>
    %159 = arith.index_cast %136 : i32 to index
    %c0_43 = arith.constant 0 : index
    %160 = vector.load %arg1[%159, %c0_43] : memref<64x128xf32, #tpu.memory_space<vmem>>, vector<8x64xf32>
    %cst_44 = arith.constant 5.000000e-01 : f32
    %161 = vector.broadcast %cst_44 : f32 to vector<8x64xf32>
    %162 = arith.cmpf ogt, %160, %161 : vector<8x64xf32>
    %163 = arith.select %162, %156, %126 : vector<8x64xi1>, vector<8x64xf32>
    %164 = arith.select %162, %158, %127 : vector<8x64xi1>, vector<8x64xf32>
    %165 = vector.extract_strided_slice %158 {offsets = [0, 0], sizes = [8, 32], strides = [1, 1]} : vector<8x64xf32> to vector<8x32xf32>
    %166 = arith.index_cast %136 : i32 to index
    %c0_45 = arith.constant 0 : index
    %167 = vector.load %arg6[%166, %c0_45] : memref<64x64xf32, #tpu.memory_space<vmem>>, vector<8x32xf32>
    tpu.vector_store %arg6[%166, %c0_45], %165 {strides = array<i32>} : memref<64x64xf32, #tpu.memory_space<vmem>>, vector<8x32xf32>,
    %168 = vector.extract_strided_slice %158 {offsets = [0, 32], sizes = [8, 32], strides = [1, 1]} : vector<8x64xf32> to vector<8x32xf32>
    %169 = arith.index_cast %138 : i32 to index
    %c32_46 = arith.constant 32 : index
    %170 = vector.load %arg6[%169, %c32_46] : memref<64x64xf32, #tpu.memory_space<vmem>>, vector<8x32xf32>
    tpu.vector_store %arg6[%169, %c32_46], %168 {strides = array<i32>} : memref<64x64xf32, #tpu.memory_space<vmem>>, vector<8x32xf32>,
    %c4_i32 = arith.constant 4 : i32
    %c7_i32_47 = arith.constant 7 : i32
    %171 = arith.subi %c7_i32_47, %c4_i32 : i32
    %c8_i32_48 = arith.constant 8 : i32
    %172 = arith.muli %c4_i32, %c8_i32_48 : i32
    %173 = tpu.assume_multiple %172, 8 : i32
    %c8_i32_49 = arith.constant 8 : i32
    %174 = arith.muli %171, %c8_i32_49 : i32
    %175 = tpu.assume_multiple %174, 8 : i32
    %cst_50 = arith.constant dense<0.000000e+00> : vector<8x256xf32>
    %176 = tpu.matmul %164, %1, %cst_50 {dimension_numbers = #tpu.dot_dimension_numbers<[1], [0], [0], [1], [0, 0, 1, 1], [], []>} : vector<8x64xf32>, vector<64x256xf32>, vector<8x256xf32> -> vector<8x256xf32>
    %177 = arith.index_cast %173 : i32 to index
    %c0_51 = arith.constant 0 : index
    %178 = vector.load %arg5[%177, %c0_51] : memref<64x256xf32, #tpu.memory_space<vmem>>, vector<8x256xf32>
    %179 = arith.addf %176, %178 : vector<8x256xf32>
    %180 = vector.broadcast %17 : vector<1x256xf32> to vector<8x256xf32>
    %181 = arith.mulf %179, %180 : vector<8x256xf32>
    %182 = math.tanh %181 : vector<8x256xf32>
    %183 = vector.broadcast %17 : vector<1x256xf32> to vector<8x256xf32>
    %184 = arith.mulf %182, %183 : vector<8x256xf32>
    %185 = vector.broadcast %20 : vector<1x256xf32> to vector<8x256xf32>
    %186 = arith.addf %184, %185 : vector<8x256xf32>
    %187 = vector.extract_strided_slice %186 {offsets = [0, 0], sizes = [8, 64], strides = [1, 1]} : vector<8x256xf32> to vector<8x64xf32>
    %188 = vector.extract_strided_slice %186 {offsets = [0, 64], sizes = [8, 64], strides = [1, 1]} : vector<8x256xf32> to vector<8x64xf32>
    %189 = vector.extract_strided_slice %186 {offsets = [0, 128], sizes = [8, 64], strides = [1, 1]} : vector<8x256xf32> to vector<8x64xf32>
    %190 = vector.extract_strided_slice %186 {offsets = [0, 192], sizes = [8, 64], strides = [1, 1]} : vector<8x256xf32> to vector<8x64xf32>
    %191 = arith.mulf %188, %163 : vector<8x64xf32>
    %192 = arith.mulf %187, %189 : vector<8x64xf32>
    %193 = arith.addf %191, %192 : vector<8x64xf32>
    %194 = math.tanh %193 : vector<8x64xf32>
    %195 = arith.mulf %190, %194 : vector<8x64xf32>
    %196 = arith.index_cast %173 : i32 to index
    %c0_52 = arith.constant 0 : index
    %197 = vector.load %arg1[%196, %c0_52] : memref<64x128xf32, #tpu.memory_space<vmem>>, vector<8x64xf32>
    %cst_53 = arith.constant 5.000000e-01 : f32
    %198 = vector.broadcast %cst_53 : f32 to vector<8x64xf32>
    %199 = arith.cmpf ogt, %197, %198 : vector<8x64xf32>
    %200 = arith.select %199, %193, %163 : vector<8x64xi1>, vector<8x64xf32>
    %201 = arith.select %199, %195, %164 : vector<8x64xi1>, vector<8x64xf32>
    %202 = vector.extract_strided_slice %195 {offsets = [0, 0], sizes = [8, 32], strides = [1, 1]} : vector<8x64xf32> to vector<8x32xf32>
    %203 = arith.index_cast %173 : i32 to index
    %c0_54 = arith.constant 0 : index
    %204 = vector.load %arg6[%203, %c0_54] : memref<64x64xf32, #tpu.memory_space<vmem>>, vector<8x32xf32>
    tpu.vector_store %arg6[%203, %c0_54], %202 {strides = array<i32>} : memref<64x64xf32, #tpu.memory_space<vmem>>, vector<8x32xf32>,
    %205 = vector.extract_strided_slice %195 {offsets = [0, 32], sizes = [8, 32], strides = [1, 1]} : vector<8x64xf32> to vector<8x32xf32>
    %206 = arith.index_cast %175 : i32 to index
    %c32_55 = arith.constant 32 : index
    %207 = vector.load %arg6[%206, %c32_55] : memref<64x64xf32, #tpu.memory_space<vmem>>, vector<8x32xf32>
    tpu.vector_store %arg6[%206, %c32_55], %205 {strides = array<i32>} : memref<64x64xf32, #tpu.memory_space<vmem>>, vector<8x32xf32>,
    %c5_i32 = arith.constant 5 : i32
    %c7_i32_56 = arith.constant 7 : i32
    %208 = arith.subi %c7_i32_56, %c5_i32 : i32
    %c8_i32_57 = arith.constant 8 : i32
    %209 = arith.muli %c5_i32, %c8_i32_57 : i32
    %210 = tpu.assume_multiple %209, 8 : i32
    %c8_i32_58 = arith.constant 8 : i32
    %211 = arith.muli %208, %c8_i32_58 : i32
    %212 = tpu.assume_multiple %211, 8 : i32
    %cst_59 = arith.constant dense<0.000000e+00> : vector<8x256xf32>
    %213 = tpu.matmul %201, %1, %cst_59 {dimension_numbers = #tpu.dot_dimension_numbers<[1], [0], [0], [1], [0, 0, 1, 1], [], []>} : vector<8x64xf32>, vector<64x256xf32>, vector<8x256xf32> -> vector<8x256xf32>
    %214 = arith.index_cast %210 : i32 to index
    %c0_60 = arith.constant 0 : index
    %215 = vector.load %arg5[%214, %c0_60] : memref<64x256xf32, #tpu.memory_space<vmem>>, vector<8x256xf32>
    %216 = arith.addf %213, %215 : vector<8x256xf32>
    %217 = vector.broadcast %17 : vector<1x256xf32> to vector<8x256xf32>
    %218 = arith.mulf %216, %217 : vector<8x256xf32>
    %219 = math.tanh %218 : vector<8x256xf32>
    %220 = vector.broadcast %17 : vector<1x256xf32> to vector<8x256xf32>
    %221 = arith.mulf %219, %220 : vector<8x256xf32>
    %222 = vector.broadcast %20 : vector<1x256xf32> to vector<8x256xf32>
    %223 = arith.addf %221, %222 : vector<8x256xf32>
    %224 = vector.extract_strided_slice %223 {offsets = [0, 0], sizes = [8, 64], strides = [1, 1]} : vector<8x256xf32> to vector<8x64xf32>
    %225 = vector.extract_strided_slice %223 {offsets = [0, 64], sizes = [8, 64], strides = [1, 1]} : vector<8x256xf32> to vector<8x64xf32>
    %226 = vector.extract_strided_slice %223 {offsets = [0, 128], sizes = [8, 64], strides = [1, 1]} : vector<8x256xf32> to vector<8x64xf32>
    %227 = vector.extract_strided_slice %223 {offsets = [0, 192], sizes = [8, 64], strides = [1, 1]} : vector<8x256xf32> to vector<8x64xf32>
    %228 = arith.mulf %225, %200 : vector<8x64xf32>
    %229 = arith.mulf %224, %226 : vector<8x64xf32>
    %230 = arith.addf %228, %229 : vector<8x64xf32>
    %231 = math.tanh %230 : vector<8x64xf32>
    %232 = arith.mulf %227, %231 : vector<8x64xf32>
    %233 = arith.index_cast %210 : i32 to index
    %c0_61 = arith.constant 0 : index
    %234 = vector.load %arg1[%233, %c0_61] : memref<64x128xf32, #tpu.memory_space<vmem>>, vector<8x64xf32>
    %cst_62 = arith.constant 5.000000e-01 : f32
    %235 = vector.broadcast %cst_62 : f32 to vector<8x64xf32>
    %236 = arith.cmpf ogt, %234, %235 : vector<8x64xf32>
    %237 = arith.select %236, %230, %200 : vector<8x64xi1>, vector<8x64xf32>
    %238 = arith.select %236, %232, %201 : vector<8x64xi1>, vector<8x64xf32>
    %239 = vector.extract_strided_slice %232 {offsets = [0, 0], sizes = [8, 32], strides = [1, 1]} : vector<8x64xf32> to vector<8x32xf32>
    %240 = arith.index_cast %210 : i32 to index
    %c0_63 = arith.constant 0 : index
    %241 = vector.load %arg6[%240, %c0_63] : memref<64x64xf32, #tpu.memory_space<vmem>>, vector<8x32xf32>
    tpu.vector_store %arg6[%240, %c0_63], %239 {strides = array<i32>} : memref<64x64xf32, #tpu.memory_space<vmem>>, vector<8x32xf32>,
    %242 = vector.extract_strided_slice %232 {offsets = [0, 32], sizes = [8, 32], strides = [1, 1]} : vector<8x64xf32> to vector<8x32xf32>
    %243 = arith.index_cast %212 : i32 to index
    %c32_64 = arith.constant 32 : index
    %244 = vector.load %arg6[%243, %c32_64] : memref<64x64xf32, #tpu.memory_space<vmem>>, vector<8x32xf32>
    tpu.vector_store %arg6[%243, %c32_64], %242 {strides = array<i32>} : memref<64x64xf32, #tpu.memory_space<vmem>>, vector<8x32xf32>,
    %c6_i32 = arith.constant 6 : i32
    %c7_i32_65 = arith.constant 7 : i32
    %245 = arith.subi %c7_i32_65, %c6_i32 : i32
    %c8_i32_66 = arith.constant 8 : i32
    %246 = arith.muli %c6_i32, %c8_i32_66 : i32
    %247 = tpu.assume_multiple %246, 8 : i32
    %c8_i32_67 = arith.constant 8 : i32
    %248 = arith.muli %245, %c8_i32_67 : i32
    %249 = tpu.assume_multiple %248, 8 : i32
    %cst_68 = arith.constant dense<0.000000e+00> : vector<8x256xf32>
    %250 = tpu.matmul %238, %1, %cst_68 {dimension_numbers = #tpu.dot_dimension_numbers<[1], [0], [0], [1], [0, 0, 1, 1], [], []>} : vector<8x64xf32>, vector<64x256xf32>, vector<8x256xf32> -> vector<8x256xf32>
    %251 = arith.index_cast %247 : i32 to index
    %c0_69 = arith.constant 0 : index
    %252 = vector.load %arg5[%251, %c0_69] : memref<64x256xf32, #tpu.memory_space<vmem>>, vector<8x256xf32>
    %253 = arith.addf %250, %252 : vector<8x256xf32>
    %254 = vector.broadcast %17 : vector<1x256xf32> to vector<8x256xf32>
    %255 = arith.mulf %253, %254 : vector<8x256xf32>
    %256 = math.tanh %255 : vector<8x256xf32>
    %257 = vector.broadcast %17 : vector<1x256xf32> to vector<8x256xf32>
    %258 = arith.mulf %256, %257 : vector<8x256xf32>
    %259 = vector.broadcast %20 : vector<1x256xf32> to vector<8x256xf32>
    %260 = arith.addf %258, %259 : vector<8x256xf32>
    %261 = vector.extract_strided_slice %260 {offsets = [0, 0], sizes = [8, 64], strides = [1, 1]} : vector<8x256xf32> to vector<8x64xf32>
    %262 = vector.extract_strided_slice %260 {offsets = [0, 64], sizes = [8, 64], strides = [1, 1]} : vector<8x256xf32> to vector<8x64xf32>
    %263 = vector.extract_strided_slice %260 {offsets = [0, 128], sizes = [8, 64], strides = [1, 1]} : vector<8x256xf32> to vector<8x64xf32>
    %264 = vector.extract_strided_slice %260 {offsets = [0, 192], sizes = [8, 64], strides = [1, 1]} : vector<8x256xf32> to vector<8x64xf32>
    %265 = arith.mulf %262, %237 : vector<8x64xf32>
    %266 = arith.mulf %261, %263 : vector<8x64xf32>
    %267 = arith.addf %265, %266 : vector<8x64xf32>
    %268 = math.tanh %267 : vector<8x64xf32>
    %269 = arith.mulf %264, %268 : vector<8x64xf32>
    %270 = arith.index_cast %247 : i32 to index
    %c0_70 = arith.constant 0 : index
    %271 = vector.load %arg1[%270, %c0_70] : memref<64x128xf32, #tpu.memory_space<vmem>>, vector<8x64xf32>
    %cst_71 = arith.constant 5.000000e-01 : f32
    %272 = vector.broadcast %cst_71 : f32 to vector<8x64xf32>
    %273 = arith.cmpf ogt, %271, %272 : vector<8x64xf32>
    %274 = arith.select %273, %267, %237 : vector<8x64xi1>, vector<8x64xf32>
    %275 = arith.select %273, %269, %238 : vector<8x64xi1>, vector<8x64xf32>
    %276 = vector.extract_strided_slice %269 {offsets = [0, 0], sizes = [8, 32], strides = [1, 1]} : vector<8x64xf32> to vector<8x32xf32>
    %277 = arith.index_cast %247 : i32 to index
    %c0_72 = arith.constant 0 : index
    %278 = vector.load %arg6[%277, %c0_72] : memref<64x64xf32, #tpu.memory_space<vmem>>, vector<8x32xf32>
    tpu.vector_store %arg6[%277, %c0_72], %276 {strides = array<i32>} : memref<64x64xf32, #tpu.memory_space<vmem>>, vector<8x32xf32>,
    %279 = vector.extract_strided_slice %269 {offsets = [0, 32], sizes = [8, 32], strides = [1, 1]} : vector<8x64xf32> to vector<8x32xf32>
    %280 = arith.index_cast %249 : i32 to index
    %c32_73 = arith.constant 32 : index
    %281 = vector.load %arg6[%280, %c32_73] : memref<64x64xf32, #tpu.memory_space<vmem>>, vector<8x32xf32>
    tpu.vector_store %arg6[%280, %c32_73], %279 {strides = array<i32>} : memref<64x64xf32, #tpu.memory_space<vmem>>, vector<8x32xf32>,
    %c7_i32_74 = arith.constant 7 : i32
    %c7_i32_75 = arith.constant 7 : i32
    %282 = arith.subi %c7_i32_75, %c7_i32_74 : i32
    %c8_i32_76 = arith.constant 8 : i32
    %283 = arith.muli %c7_i32_74, %c8_i32_76 : i32
    %284 = tpu.assume_multiple %283, 8 : i32
    %c8_i32_77 = arith.constant 8 : i32
    %285 = arith.muli %282, %c8_i32_77 : i32
    %286 = tpu.assume_multiple %285, 8 : i32
    %cst_78 = arith.constant dense<0.000000e+00> : vector<8x256xf32>
    %287 = tpu.matmul %275, %1, %cst_78 {dimension_numbers = #tpu.dot_dimension_numbers<[1], [0], [0], [1], [0, 0, 1, 1], [], []>} : vector<8x64xf32>, vector<64x256xf32>, vector<8x256xf32> -> vector<8x256xf32>
    %288 = arith.index_cast %284 : i32 to index
    %c0_79 = arith.constant 0 : index
    %289 = vector.load %arg5[%288, %c0_79] : memref<64x256xf32, #tpu.memory_space<vmem>>, vector<8x256xf32>
    %290 = arith.addf %287, %289 : vector<8x256xf32>
    %291 = vector.broadcast %17 : vector<1x256xf32> to vector<8x256xf32>
    %292 = arith.mulf %290, %291 : vector<8x256xf32>
    %293 = math.tanh %292 : vector<8x256xf32>
    %294 = vector.broadcast %17 : vector<1x256xf32> to vector<8x256xf32>
    %295 = arith.mulf %293, %294 : vector<8x256xf32>
    %296 = vector.broadcast %20 : vector<1x256xf32> to vector<8x256xf32>
    %297 = arith.addf %295, %296 : vector<8x256xf32>
    %298 = vector.extract_strided_slice %297 {offsets = [0, 0], sizes = [8, 64], strides = [1, 1]} : vector<8x256xf32> to vector<8x64xf32>
    %299 = vector.extract_strided_slice %297 {offsets = [0, 64], sizes = [8, 64], strides = [1, 1]} : vector<8x256xf32> to vector<8x64xf32>
    %300 = vector.extract_strided_slice %297 {offsets = [0, 128], sizes = [8, 64], strides = [1, 1]} : vector<8x256xf32> to vector<8x64xf32>
    %301 = vector.extract_strided_slice %297 {offsets = [0, 192], sizes = [8, 64], strides = [1, 1]} : vector<8x256xf32> to vector<8x64xf32>
    %302 = arith.mulf %299, %274 : vector<8x64xf32>
    %303 = arith.mulf %298, %300 : vector<8x64xf32>
    %304 = arith.addf %302, %303 : vector<8x64xf32>
    %305 = math.tanh %304 : vector<8x64xf32>
    %306 = arith.mulf %301, %305 : vector<8x64xf32>
    %307 = arith.index_cast %284 : i32 to index
    %c0_80 = arith.constant 0 : index
    %308 = vector.load %arg1[%307, %c0_80] : memref<64x128xf32, #tpu.memory_space<vmem>>, vector<8x64xf32>
    %cst_81 = arith.constant 5.000000e-01 : f32
    %309 = vector.broadcast %cst_81 : f32 to vector<8x64xf32>
    %310 = arith.cmpf ogt, %308, %309 : vector<8x64xf32>
    %311 = arith.select %310, %304, %274 : vector<8x64xi1>, vector<8x64xf32>
    %312 = arith.select %310, %306, %275 : vector<8x64xi1>, vector<8x64xf32>
    %313 = vector.extract_strided_slice %306 {offsets = [0, 0], sizes = [8, 32], strides = [1, 1]} : vector<8x64xf32> to vector<8x32xf32>
    %314 = arith.index_cast %284 : i32 to index
    %c0_82 = arith.constant 0 : index
    %315 = vector.load %arg6[%314, %c0_82] : memref<64x64xf32, #tpu.memory_space<vmem>>, vector<8x32xf32>
    tpu.vector_store %arg6[%314, %c0_82], %313 {strides = array<i32>} : memref<64x64xf32, #tpu.memory_space<vmem>>, vector<8x32xf32>,
    %316 = vector.extract_strided_slice %306 {offsets = [0, 32], sizes = [8, 32], strides = [1, 1]} : vector<8x64xf32> to vector<8x32xf32>
    %317 = arith.index_cast %286 : i32 to index
    %c32_83 = arith.constant 32 : index
    %318 = vector.load %arg6[%317, %c32_83] : memref<64x64xf32, #tpu.memory_space<vmem>>, vector<8x32xf32>
    tpu.vector_store %arg6[%317, %c32_83], %316 {strides = array<i32>} : memref<64x64xf32, #tpu.memory_space<vmem>>, vector<8x32xf32>,
    %c8_i32_84 = arith.constant 8 : i32
    %c0_85 = arith.constant 0 : index
    %c0_86 = arith.constant 0 : index
    %319 = vector.load %arg6[%c0_85, %c0_86] : memref<64x64xf32, #tpu.memory_space<vmem>>, vector<64x64xf32>
    %c0_87 = arith.constant 0 : index
    %c64_88 = arith.constant 64 : index
    %320 = vector.load %arg1[%c0_87, %c64_88] : memref<64x128xf32, #tpu.memory_space<vmem>>, vector<64x64xf32>
    %321 = arith.mulf %319, %320 : vector<64x64xf32>
    %cst_89 = arith.constant dense<0.000000e+00> : vector<64x64xf32>
    %322 = tpu.matmul %321, %3, %cst_89 {dimension_numbers = #tpu.dot_dimension_numbers<[1], [0], [0], [1], [0, 0, 1, 1], [], []>} : vector<64x64xf32>, vector<64x64xf32>, vector<64x64xf32> -> vector<64x64xf32>
    %323 = tpu.concatenate %321, %322 in 1 : vector<64x64xf32>, vector<64x64xf32> -> vector<64x128xf32>
    %c0_90 = arith.constant 0 : index
    %c0_91 = arith.constant 0 : index
    %324 = vector.load %arg3[%c0_90, %c0_91] : memref<64x128xf32, #tpu.memory_space<vmem>>, vector<64x128xf32>
    tpu.vector_store %arg3[%c0_90, %c0_91], %323 {strides = array<i32>} : memref<64x128xf32, #tpu.memory_space<vmem>>, vector<64x128xf32>,
    %325 = tpu.concatenate %312, %311 in 1 : vector<8x64xf32>, vector<8x64xf32> -> vector<8x128xf32>
    %c0_92 = arith.constant 0 : index
    %c0_93 = arith.constant 0 : index
    %326 = vector.load %arg4[%c0_92, %c0_93] : memref<8x128xf32, #tpu.memory_space<vmem>>, vector<8x128xf32>
    tpu.vector_store %arg4[%c0_92, %c0_93], %325 {strides = array<i32>} : memref<8x128xf32, #tpu.memory_space<vmem>>, vector<8x128xf32>,
    return
  }
}

</mosaic_0001>

<bundles_post_ra>
// kernel: encoder_forward.1
= control target key start
LH: loop header
LB: loop body
LE: loop exit
PB: predicated region body
PF: predicated region fallthrough
CT: control target
= control target key end

     0   :  { %v1740_v3 = vmov 0.0   ;;  %vm77_vm0 = vcmask 523264   ;;  %v67_v63 = vlaneseq  ;;  %s1742_s18 = smov 64   ;;  %vm352_vm3 = vcmask 261120   ;;  %s2280_s2 = inlined_call_operand.vmem [shape: f32[200,256], index: 2, kind: input, shape index: {}]   ;;  %s2281_s0 = inlined_call_operand.vmem [shape: f32[64,64], index: 0, kind: input, shape index: {}]   ;;  %s2282_s1 = inlined_call_operand.vmem [shape: f32[64,128], index: 1, kind: input, shape index: {}]   ;;  %s2283_s3 = inlined_call_operand.vmem [shape: f32[64,128], index: 3, kind: output, shape index: {0}]   ;;  %s2284_s4 = inlined_call_operand.vmem [shape: f32[8,128], index: 4, kind: output, shape index: {1}]  }
   0x1   :  { %v17_v0 = vld [vmem:[%s2280_s2 + $0x8] sm:$0xff]  ;;  %v19_v1 = vld [vmem:[%s2280_s2 + $0x18] sm:$0xff]  ;;  %v16_v2 = vld [vmem:[%s2280_s2] sm:$0xff]  ;;  %166 = vmatprep.mubr.f32.mxu1 %v1740_v3  ;;  %546 = vmatprep.mubr.f32.mxu0 %v1740_v3  ;;  %vm355_vm4 = vcmask 523520  }
   0x2   :  { %v1497_v4 = vpack.c.bf16 %v19_v1, %v17_v0  ;;  %v18_v5 = vld [vmem:[%s2280_s2 + $0x10] sm:$0xff]  ;;  %v21_v6 = vld [vmem:[%s2280_s2 + $0x28] sm:$0xff]  ;;  %v23_v7 = vld [vmem:[%s2280_s2 + $0x38] sm:$0xff] }
   0x3   :  { %v1499_v8 = vpack.c.bf16 %v18_v5, %v16_v2  ;;  %v1501_v9 = vpack.c.bf16 %v23_v7, %v21_v6  ;;  %v20_v10 = vld [vmem:[%s2280_s2 + $0x20] sm:$0xff]  ;;  %v22_v11 = vld [vmem:[%s2280_s2 + $0x30] sm:$0xff]  ;;  %v25_v12 = vld [vmem:[%s2280_s2 + $0x48] sm:$0xff]  ;;  %v232_v2 = vand.u32 127, %v67_v63 }
   0x4   :  { %1498 = vmatprep.subr.bf16.mxu1 %v1497_v4  ;;  %v27_v13 = vld [vmem:[%s2280_s2 + $0x58] sm:$0xff]  ;;  %v1503_v14 = vpack.c.bf16 %v22_v11, %v20_v10  ;;  %v24_v15 = vld [vmem:[%s2280_s2 + $0x40] sm:$0xff]  ;;  %v26_v16 = vld [vmem:[%s2280_s2 + $0x50] sm:$0xff]  ;;  %v68_v4 = vshrl.u32 %v67_v63, 7 }
   0x5   :  { %1500 = vmatpush1.bf16.msra.mxu1 %v1499_v8  ;;  %v1505_v17 = vpack.c.bf16 %v27_v13, %v25_v12  ;;  %v29_v18 = vld [vmem:[%s2280_s2 + $0x68] sm:$0xff]  ;;  %v31_v19 = vld [vmem:[%s2280_s2 + $0x78] sm:$0xff]  ;;  %v32_v22 = vld [vmem:[%s2280_s2 + $0x80] sm:$0xff]  ;;  %v1507_v26 = vpack.c.bf16 %v26_v16, %v24_v15  ;;  %v233_v7 = vadd.s32 128, %v232_v2 }
   0x6   :  { %1502 = vmatprep.subr.bf16.mxu1 %v1501_v9  ;;  %v33_v20 = vld [vmem:[%s2280_s2 + $0x88] sm:$0xff]  ;;  %v35_v21 = vld [vmem:[%s2280_s2 + $0x98] sm:$0xff]  ;;  %v34_v23 = vld [vmem:[%s2280_s2 + $0x90] sm:$0xff]  ;;  %v1509_v30 = vpack.c.bf16 %v31_v19, %v29_v18  ;;  %v69_v8 = vsub.s32 0, %v68_v4  ;;  %v73_v10 = vsub.s32 1, %v68_v4 }
   0x7   :  { %v1824_v24 = vpack.c.bf16 %v35_v21, %v33_v20  ;;  %v37_v25 = vld [vmem:[%s2280_s2 + $0xa8] sm:$0xff]  ;;  %v28_v27 = vld [vmem:[%s2280_s2 + $0x60] sm:$0xff]  ;;  %v1832_v28 = vpack.c.bf16 %v34_v23, %v32_v22  ;;  %v39_v29 = vld [vmem:[%s2280_s2 + $0xb8] sm:$0xff]  ;;  %vm237_vm1 = vcmp.lt.s32.totalorder %v233_v7, 192 }
   0x8   :  { %v30_v31 = vld [vmem:[%s2280_s2 + $0x70] sm:$0xff]  ;;  %v1840_v32 = vpack.c.bf16 %v39_v29, %v37_v25  ;;  %v36_v33 = vld [vmem:[%s2280_s2 + $0xa0] sm:$0xff]  ;;  %v41_v35 = vld [vmem:[%s2280_s2 + $0xc8] sm:$0xff] }
   0x9   :  { %1504 = vmatpush1.bf16.msra.mxu1 %v1503_v14  ;;  %v38_v34 = vld [vmem:[%s2280_s2 + $0xb0] sm:$0xff]  ;;  %1546 = vmatprep.subr.bf16.mxu0 %v1824_v24  ;;  %v43_v36 = vld [vmem:[%s2280_s2 + $0xd8] sm:$0xff]  ;;  %v1511_v37 = vpack.c.bf16 %v30_v31, %v28_v27  ;;  %v40_v40 = vld [vmem:[%s2280_s2 + $0xc0] sm:$0xff] }
   0xa   :  { %1506 = vmatprep.subr.bf16.mxu1 %v1505_v17  ;;  %1548 = vmatpush1.bf16.msra.mxu0 %v1832_v28  ;;  %v1857_v38 = vpack.c.bf16 %v38_v34, %v36_v33  ;;  %v1859_v39 = vpack.c.bf16 %v43_v36, %v41_v35  ;;  %v42_v41 = vld [vmem:[%s2280_s2 + $0xd0] sm:$0xff]  ;;  %v45_v42 = vld [vmem:[%s2280_s2 + $0xe8] sm:$0xff]  ;;  %v47_v43 = vld [vmem:[%s2280_s2 + $0xf8] sm:$0xff]  ;;  %v1741_v17 = vmov 0.5  }
   0xb   :  { %1550 = vmatprep.subr.bf16.mxu0 %v1840_v32  ;;  %v58_v44 = vld [vmem:[%s2281_s0] sm:$0xff]  ;;  %v1878_v45 = vpack.c.bf16 %v42_v41, %v40_v40  ;;  %v1881_v46 = vpack.c.bf16 %v47_v43, %v45_v42  ;;  %v46_v48 = vld [vmem:[%s2280_s2 + $0xf0] sm:$0xff]  ;;  %v59_v49 = vld [vmem:[%s2281_s0 + $0x8] sm:$0xff]  ;;  %v1981_v18 = vsel %vm237_vm1, 1.0, %v1741_v17 }
   0xc   :  { %v44_v47 = vld [vmem:[%s2280_s2 + $0xe0] sm:$0xff]  ;;  %v60_v51 = vld [vmem:[%s2281_s0 + $0x10] sm:$0xff]  ;;  %v61_v52 = vld [vmem:[%s2281_s0 + $0x18] sm:$0xff] }
   0xd   :  { %1508 = vmatpush1.bf16.msra.mxu1 %v1507_v26  ;;  %v1897_v50 = vpack.c.bf16 %v46_v48, %v44_v47  ;;  %v62_v53 = vld [vmem:[%s2281_s0 + $0x20] sm:$0xff]  ;;  %v63_v54 = vld [vmem:[%s2281_s0 + $0x28] sm:$0xff]  ;;  %v64_v55 = vld [vmem:[%s2281_s0 + $0x30] sm:$0xff]  ;;  %v1985_v26 = vsel %vm237_vm1, 0.0, %v1741_v17 }
   0xe   :  { %1510 = vmatprep.subr.bf16.mxu1 %v1509_v30  ;;  %1552 = vmatpush1.bf16.msra.mxu0 %v1857_v38  ;;  %v65_v56 = vld [vmem:[%s2281_s0 + $0x38] sm:$0xff]  ;;  %v1422_v9 = vld [vmem:[%s2280_s2 + $0x100] ss:$8 sm:$0x3] }
   0xf   :  { %1554 = vmatprep.subr.bf16.mxu0 %v1859_v39  ;;  %v1976_v13 = vrot.slane %v1422_v9, %v69_v8  ;;  %v1978_v14 = vrot.slane %v1422_v9, %v73_v10  ;;  %v1995_v41 = vld [vmem:[%s2282_s1] sm:$0xff] }
  0x10   :  { %vm341_vm2 = vcmp.gt.f32.partialorder %v1995_v41, 0.5 }
  0x11   :  { %1512 = vmatpush1.bf16.msra.mxu1 %v1511_v37 }
  0x12   :  { %1514 = vmatprep.subr.bf16.mxu1 %v1824_v24  ;;  %1556 = vmatpush1.bf16.msra.mxu0 %v1878_v45 }
  0x13   :  { %1558 = vmatprep.subr.bf16.mxu0 %v1881_v46 }
  0x14   :  { %1423 = vmatmul.mubr.msk.f32.vlgmr.msra.gmra.mrb[0].mxu1 %vm77_vm0, %v58_v44 }
  0x15   :  { %1516 = vmatpush1.bf16.msra.mxu1 %v1832_v28  ;;  %172 = vmatprep.mubr.f32.mxu1 %v1740_v3 }
  0x16   :  { %1518 = vmatprep.subr.bf16.mxu1 %v1840_v32  ;;  %1560 = vmatpush1.bf16.msra.mxu0 %v1897_v50 }
  0x17   :  { %1562 = vmatprep.subr.bf16.mxu0 %v1824_v24 }
  0x18   :  { %1424 = vmatmul.mubr.msk.f32.gmra.mrb[2].mxu1 %vm77_vm0, %v59_v49 }
  0x19   :  { %178 = vmatprep.mubr.f32.mxu1 %v1740_v3  ;;  %1520 = vmatpush1.bf16.msra.mxu1 %v1857_v38 }
  0x1a   :  { %1522 = vmatprep.subr.bf16.mxu1 %v1859_v39 }
  0x1c   :  { %1425 = vmatmul.mubr.msk.f32.gmra.mrb[4].mxu1 %vm77_vm0, %v60_v51 }
  0x1d   :  { %184 = vmatprep.mubr.f32.mxu1 %v1740_v3  ;;  %1524 = vmatpush1.bf16.msra.mxu1 %v1878_v45 }
  0x1e   :  { %1526 = vmatprep.subr.bf16.mxu1 %v1881_v46 }
  0x20   :  { %1426 = vmatmul.mubr.msk.f32.gmra.mrb[6].mxu1 %vm77_vm0, %v61_v52 }
  0x21   :  { %190 = vmatprep.mubr.f32.mxu1 %v1740_v3  ;;  %1528 = vmatpush1.bf16.msra.mxu1 %v1897_v50 }
  0x22   :  { %1530 = vmatprep.subr.bf16.mxu1 %v1824_v24 }
  0x24   :  { %1427 = vmatmul.mubr.msk.f32.gmra.mrb[8].mxu1 %vm77_vm0, %v62_v53 }
  0x25   :  { %196 = vmatprep.mubr.f32.mxu1 %v1740_v3 }
  0x28   :  { %1428 = vmatmul.mubr.msk.f32.gmra.mrb[10].mxu1 %vm77_vm0, %v63_v54 }
  0x29   :  { %202 = vmatprep.mubr.f32.mxu1 %v1740_v3 }
  0x2c   :  { %1429 = vmatmul.mubr.msk.f32.gmra.mrb[12].mxu1 %vm77_vm0, %v64_v55 }
  0x2d   :  { %208 = vmatprep.mubr.f32.mxu1 %v1740_v3 }
  0x30   :  { %1430 = vmatmul.mubr.msk.f32.gmra.mrb[14].mxu1 %vm77_vm0, %v65_v56 }
  0x31   :  { %316 = vmatprep.mubr.f32.mxu1 %v1740_v3 }
  0x34   :  { %317 = vmatmul.mubr.f32.vlgmr.msra.gmra.mrb[0].mxu1 %v1740_v3 }
  0x35   :  { %1532 = vmatpush1.bf16.msra.mxu1 %v1832_v28  ;;  %429 = vmatprep.mubr.f32.mxu1 %v1740_v3 }
  0x36   :  { %1534 = vmatprep.subr.bf16.mxu1 %v1840_v32 }
  0x39   :  { %1536 = vmatpush1.bf16.msra.mxu1 %v1857_v38 }
  0x3a   :  { %1538 = vmatprep.subr.bf16.mxu1 %v1859_v39 }
  0x3d   :  { %1540 = vmatpush1.bf16.msra.mxu1 %v1878_v45 }
  0x3e   :  { %1542 = vmatprep.subr.bf16.mxu1 %v1881_v46 }
  0x41   :  { %1544 = vmatpush1.bf16.msra.mxu1 %v1897_v50 }
  0xef   :  { %v1949_v57 = vpop.f32.mrb[4].mxu1 }
  0xf0   :  { %v1951_v58 = vpop.f32.mrb[5].mxu1 }
  0xf3   :  { %v1953_v59 = vpop.f32.mrb[6].mxu1 }
  0xf4   :  { %v1955_v60 = vpop.f32.mrb[7].mxu1 }
  0xf7   :  { %v1957_v61 = vpop.f32.mrb[8].mxu1 }
  0xf8   :  { %v1959_v62 = vpop.f32.mrb[9].mxu1 }
  0xfb   :  { %v1961_v0 = vpop.f32.mrb[10].mxu1 }
  0xfc   :  { %v1963_v1 = vpop.f32.mrb[11].mxu1 }
  0xff   :  { %v1965_v5 = vpop.f32.mrb[12].mxu1 }
 0x100   :  { %v1967_v6 = vpop.f32.mrb[13].mxu1 }
 0x103   :  { %v1972_v11 = vpop.f32.mrb[14].mxu1 }
 0x104   :  { %v1974_v12 = vpop.f32.mrb[15].mxu1 }
 0x107   :  { %v318_v15 = vpop.f32.mrb[0].mxu1 }
 0x108   :  { %v1657_v16 = vadd.f32 %v318_v15, %v1976_v13  ;;  %v320_v19 = vpop.f32.mrb[1].mxu1 }
 0x109   :  { %v1658_v20 = vadd.f32 %v320_v19, %v1978_v14 }
 0x10a   :  { %v323_v21 = vmul.f32 0.5, %v1657_v16 }
 0x10b   :  { %v324_v22 = vmul.f32 %v1658_v20, %v1981_v18  ;;  %v2013_v20 = vld [vmem:[%s2282_s1 + $0x8] sm:$0xff] }
 0x10c   :  { %1692 = vtanh.f32 %v323_v21  ;;  %vm459_vm5 = vcmp.gt.f32.partialorder %v2013_v20, 0.5 }
 0x10d   :  { %1694 = vtanh.f32 %v324_v22 }
 0x116   :  { %v1693_v23 = vpop.eup %1692 }
 0x117   :  { %v1695_v25 = vpop.eup %1694  ;;  %v327_v27 = vmul.f32 0.5, %v1693_v23 }
 0x118   :  { %v328_v29 = vmul.f32 %v1695_v25, %v1981_v18 }
 0x119   :  { %v329_v30 = vadd.f32 0.5, %v327_v27  ;;  %v181_v27 = vadd.f32 %v1949_v57, %v1976_v13 }
 0x11a   :  { %v330_v31 = vadd.f32 %v328_v29, %v1985_v26  ;;  %v183_v29 = vadd.f32 %v1951_v58, %v1978_v14 }
 0x11b   :  { %v331_v34 = vmul.f32 0.0, %v329_v30 }
 0x11c   :  { %v332_v33 = vmul.f32 %v330_v31, %v329_v30 }
 0x11e   :  { %334 = vrot.lane.b32.xlu0 %v332_v33, %s1742_s18 }
 0x190   :  { %v335_v35 = vpop.permute.xlu0 %334 }
 0x191   :  { %v337_v36 = vadd.f32 %v335_v35, %v331_v34 }
 0x193   :  { %1696 = vtanh.f32 %v337_v36  ;;  %343 = vrot.lane.b32.xlu1 %v337_v36, %s1742_s18 }
 0x19d   :  { %v1697_v37 = vpop.eup %1696 }
 0x19e   :  { %v339_v40 = vmul.f32 %v1697_v37, %v330_v31 }
 0x1a0   :  { %348 = vrot.lane.b32.xlu0 %v339_v40, %s1742_s18 }
 0x205   :  { %v344_v42 = vpop.permute.xlu1 %343 }
 0x206   :  { %v346_v43 = vsel %vm341_vm2, %v344_v42, 0.0 }
 0x207   :  { %445 = vrot.lane.b32.xlu1 %v346_v43, %s1742_s18 }
 0x212   :  { %v349_v44 = vpop.permute.xlu0 %348 }
 0x213   :  { %v351_v47 = vsel %vm341_vm2, %v349_v44, 0.0  ;;  %353 = vst.msk [vmem:[#allocation3] sm:$0xff] %vm352_vm3, %v349_v44 }
 0x214   :  { %356 = vst.msk [vmem:[#allocation3 + $0x38] sm:$0xff] %vm355_vm4, %v349_v44  ;;  %1431 = vmatmul.mubr.msk.f32.vlgmr.msra.gmra.mrb[2].mxu1 %vm77_vm0, %v351_v47 }
 0x279   :  { %v446_v9 = vpop.permute.xlu1 %445 }
 0x2e7   :  { %v431_v48 = vpop.f32.mrb[2].mxu1 }
 0x2e8   :  { %v1659_v49 = vadd.f32 %v431_v48, %v1976_v13  ;;  %v433_v51 = vpop.f32.mrb[3].mxu1 }
 0x2e9   :  { %v1660_v52 = vadd.f32 %v433_v51, %v1978_v14 }
 0x2ea   :  { %v436_v53 = vmul.f32 0.5, %v1659_v49 }
 0x2eb   :  { %v437_v54 = vmul.f32 %v1660_v52, %v1981_v18 }
 0x2ec   :  { %1698 = vtanh.f32 %v436_v53 }
 0x2ed   :  { %1700 = vtanh.f32 %v437_v54  ;;  %v2042_v54 = vld [vmem:[%s2282_s1 + $0x10] sm:$0xff] }
 0x2ee   :  { %vm576_vm6 = vcmp.gt.f32.partialorder %v2042_v54, 0.5 }
 0x2f6   :  { %v1699_v55 = vpop.eup %1698 }
 0x2f7   :  { %v1701_v56 = vpop.eup %1700  ;;  %v440_v63 = vmul.f32 0.5, %v1699_v55 }
 0x2f8   :  { %v441_v2 = vmul.f32 %v1701_v56, %v1981_v18 }
 0x2f9   :  { %v442_v4 = vadd.f32 0.5, %v440_v63 }
 0x2fa   :  { %v443_v7 = vadd.f32 %v441_v2, %v1985_v26 }
 0x2fb   :  { %v448_v10 = vmul.f32 %v446_v9, %v442_v4 }
 0x2fc   :  { %v449_v8 = vmul.f32 %v443_v7, %v442_v4  ;;  %v187_v4 = vadd.f32 %v1953_v59, %v1976_v13 }
 0x2fe   :  { %451 = vrot.lane.b32.xlu0 %v449_v8, %s1742_s18 }
 0x370   :  { %v452_v15 = vpop.permute.xlu0 %451 }
 0x371   :  { %v454_v16 = vadd.f32 %v452_v15, %v448_v10 }
 0x373   :  { %1702 = vtanh.f32 %v454_v16  ;;  %461 = vrot.lane.b32.xlu0 %v454_v16, %s1742_s18 }
 0x37d   :  { %v1703_v17 = vpop.eup %1702 }
 0x37e   :  { %v456_v19 = vmul.f32 %v1703_v17, %v443_v7  ;;  %v189_v7 = vadd.f32 %v1955_v60, %v1978_v14 }
 0x380   :  { %466 = vrot.lane.b32.xlu1 %v456_v19, %s1742_s18 }
 0x3e5   :  { %v462_v21 = vpop.permute.xlu0 %461 }
 0x3e6   :  { %v464_v22 = vsel %vm459_vm5, %v462_v21, %v346_v43 }
 0x3e7   :  { %562 = vrot.lane.b32.xlu1 %v464_v22, %s1742_s18 }
 0x3f2   :  { %v467_v23 = vpop.permute.xlu1 %466 }
 0x3f3   :  { %471 = vst.msk [vmem:[#allocation3 + $0x8] sm:$0xff] %vm352_vm3, %v467_v23  ;;  %v469_v25 = vsel %vm459_vm5, %v467_v23, %v351_v47 }
 0x3f4   :  { %473 = vst.msk [vmem:[#allocation3 + $0x30] sm:$0xff] %vm355_vm4, %v467_v23  ;;  %1433 = vmatmul.mubr.msk.f32.vlgmr.msra.gmra.mrb[0].mxu0 %vm77_vm0, %v469_v25 }
 0x3f5   :  { %1564 = vmatpush1.bf16.msra.mxu0 %v1832_v28  ;;  %663 = vmatprep.mubr.f32.mxu0 %v1740_v3 }
 0x3f6   :  { %1566 = vmatprep.subr.bf16.mxu0 %v1840_v32 }
 0x3f9   :  { %1568 = vmatpush1.bf16.msra.mxu0 %v1857_v38 }
 0x3fa   :  { %1570 = vmatprep.subr.bf16.mxu0 %v1859_v39 }
 0x3fd   :  { %1572 = vmatpush1.bf16.msra.mxu0 %v1878_v45 }
 0x3fe   :  { %1574 = vmatprep.subr.bf16.mxu0 %v1881_v46 }
 0x401   :  { %1576 = vmatpush1.bf16.msra.mxu0 %v1897_v50 }
 0x402   :  { %1578 = vmatprep.subr.bf16.mxu0 %v1824_v24 }
 0x459   :  { %v563_v58 = vpop.permute.xlu1 %562 }
 0x4c7   :  { %v548_v30 = vpop.f32.mrb[0].mxu0 }
 0x4c8   :  { %v549_v31 = vadd.f32 %v548_v30, %v181_v27  ;;  %v550_v33 = vpop.f32.mrb[1].mxu0 }
 0x4c9   :  { %v551_v34 = vadd.f32 %v550_v33, %v183_v29 }
 0x4ca   :  { %v553_v35 = vmul.f32 0.5, %v549_v31 }
 0x4cb   :  { %v554_v36 = vmul.f32 %v551_v34, %v1981_v18 }
 0x4cc   :  { %1704 = vtanh.f32 %v553_v35  ;;  %v2071_v35 = vld [vmem:[%s2282_s1 + $0x18] sm:$0xff] }
 0x4cd   :  { %1706 = vtanh.f32 %v554_v36  ;;  %vm693_vm7 = vcmp.gt.f32.partialorder %v2071_v35, 0.5 }
 0x4d6   :  { %v1705_v37 = vpop.eup %1704 }
 0x4d7   :  { %v1707_v40 = vpop.eup %1706  ;;  %v557_v42 = vmul.f32 0.5, %v1705_v37 }
 0x4d8   :  { %v558_v43 = vmul.f32 %v1707_v40, %v1981_v18 }
 0x4d9   :  { %v559_v44 = vadd.f32 0.5, %v557_v42 }
 0x4da   :  { %v560_v57 = vadd.f32 %v558_v43, %v1985_v26  ;;  %v193_v43 = vadd.f32 %v1957_v61, %v1976_v13 }
 0x4db   :  { %v565_v48 = vmul.f32 %v563_v58, %v559_v44 }
 0x4dc   :  { %v566_v47 = vmul.f32 %v560_v57, %v559_v44  ;;  %v195_v44 = vadd.f32 %v1959_v62, %v1978_v14 }
 0x4de   :  { %568 = vrot.lane.b32.xlu0 %v566_v47, %s1742_s18 }
 0x550   :  { %v569_v49 = vpop.permute.xlu0 %568 }
 0x551   :  { %v571_v51 = vadd.f32 %v569_v49, %v565_v48 }
 0x553   :  { %1708 = vtanh.f32 %v571_v51  ;;  %578 = vrot.lane.b32.xlu0 %v571_v51, %s1742_s18 }
 0x55d   :  { %v1709_v52 = vpop.eup %1708 }
 0x55e   :  { %v573_v53 = vmul.f32 %v1709_v52, %v560_v57 }
 0x560   :  { %583 = vrot.lane.b32.xlu1 %v573_v53, %s1742_s18 }
 0x5c5   :  { %v579_v55 = vpop.permute.xlu0 %578 }
 0x5c6   :  { %v581_v56 = vsel %vm576_vm6, %v579_v55, %v464_v22 }
 0x5c7   :  { %679 = vrot.lane.b32.xlu1 %v581_v56, %s1742_s18 }
 0x5d2   :  { %v584_v63 = vpop.permute.xlu1 %583 }
 0x5d3   :  { %v586_v2 = vsel %vm576_vm6, %v584_v63, %v469_v25  ;;  %588 = vst.msk [vmem:[#allocation3 + $0x10] sm:$0xff] %vm352_vm3, %v584_v63 }
 0x5d4   :  { %590 = vst.msk [vmem:[#allocation3 + $0x28] sm:$0xff] %vm355_vm4, %v584_v63  ;;  %1435 = vmatmul.mubr.msk.f32.vlgmr.msra.gmra.mrb[2].mxu0 %vm77_vm0, %v586_v2 }
 0x5d5   :  { %1580 = vmatpush1.bf16.msra.mxu0 %v1832_v28  ;;  %780 = vmatprep.mubr.f32.mxu0 %v1740_v3 }
 0x5d6   :  { %1582 = vmatprep.subr.bf16.mxu0 %v1840_v32 }
 0x5d9   :  { %1584 = vmatpush1.bf16.msra.mxu0 %v1857_v38 }
 0x5da   :  { %1586 = vmatprep.subr.bf16.mxu0 %v1859_v39 }
 0x5dd   :  { %1588 = vmatpush1.bf16.msra.mxu0 %v1878_v45 }
 0x5de   :  { %1590 = vmatprep.subr.bf16.mxu0 %v1881_v46 }
 0x5e1   :  { %1592 = vmatpush1.bf16.msra.mxu0 %v1897_v50 }
 0x5e2   :  { %1594 = vmatprep.subr.bf16.mxu0 %v1824_v24 }
 0x639   :  { %v680_v60 = vpop.permute.xlu1 %679 }
 0x6a7   :  { %v665_v8 = vpop.f32.mrb[2].mxu0 }
 0x6a8   :  { %v666_v9 = vadd.f32 %v665_v8, %v187_v4  ;;  %v667_v10 = vpop.f32.mrb[3].mxu0 }
 0x6a9   :  { %v668_v15 = vadd.f32 %v667_v10, %v189_v7 }
 0x6aa   :  { %v670_v16 = vmul.f32 0.5, %v666_v9 }
 0x6ab   :  { %v671_v17 = vmul.f32 %v668_v15, %v1981_v18  ;;  %v2100_v15 = vld [vmem:[%s2282_s1 + $0x20] sm:$0xff] }
 0x6ac   :  { %1710 = vtanh.f32 %v670_v16  ;;  %vm810_vm8 = vcmp.gt.f32.partialorder %v2100_v15, 0.5 }
 0x6ad   :  { %1712 = vtanh.f32 %v671_v17 }
 0x6b6   :  { %v1711_v19 = vpop.eup %1710 }
 0x6b7   :  { %v1713_v21 = vpop.eup %1712  ;;  %v674_v22 = vmul.f32 0.5, %v1711_v19 }
 0x6b8   :  { %v675_v23 = vmul.f32 %v1713_v21, %v1981_v18 }
 0x6b9   :  { %v676_v25 = vadd.f32 0.5, %v674_v22  ;;  %v199_v22 = vadd.f32 %v1961_v0, %v1976_v13 }
 0x6ba   :  { %v677_v59 = vadd.f32 %v675_v23, %v1985_v26  ;;  %v201_v23 = vadd.f32 %v1963_v1, %v1978_v14 }
 0x6bb   :  { %v682_v29 = vmul.f32 %v680_v60, %v676_v25 }
 0x6bc   :  { %v683_v27 = vmul.f32 %v677_v59, %v676_v25 }
 0x6be   :  { %685 = vrot.lane.b32.xlu0 %v683_v27, %s1742_s18 }
 0x730   :  { %v686_v30 = vpop.permute.xlu0 %685 }
 0x731   :  { %v688_v31 = vadd.f32 %v686_v30, %v682_v29 }
 0x733   :  { %1714 = vtanh.f32 %v688_v31  ;;  %695 = vrot.lane.b32.xlu0 %v688_v31, %s1742_s18 }
 0x73d   :  { %v1715_v33 = vpop.eup %1714 }
 0x73e   :  { %v690_v34 = vmul.f32 %v1715_v33, %v677_v59 }
 0x740   :  { %700 = vrot.lane.b32.xlu1 %v690_v34, %s1742_s18 }
 0x7a5   :  { %v696_v36 = vpop.permute.xlu0 %695 }
 0x7a6   :  { %v698_v37 = vsel %vm693_vm7, %v696_v36, %v581_v56 }
 0x7a7   :  { %796 = vrot.lane.b32.xlu1 %v698_v37, %s1742_s18 }
 0x7b2   :  { %v701_v40 = vpop.permute.xlu1 %700 }
 0x7b3   :  { %v703_v42 = vsel %vm693_vm7, %v701_v40, %v586_v2  ;;  %705 = vst.msk [vmem:[#allocation3 + $0x18] sm:$0xff] %vm352_vm3, %v701_v40 }
 0x7b4   :  { %707 = vst.msk [vmem:[#allocation3 + $0x20] sm:$0xff] %vm355_vm4, %v701_v40  ;;  %1437 = vmatmul.mubr.msk.f32.vlgmr.msra.gmra.mrb[4].mxu0 %vm77_vm0, %v703_v42 }
 0x7b5   :  { %1596 = vmatpush1.bf16.msra.mxu0 %v1832_v28  ;;  %895 = vmatprep.mubr.f32.mxu0 %v1740_v3 }
 0x7b6   :  { %1598 = vmatprep.subr.bf16.mxu0 %v1840_v32 }
 0x7b9   :  { %1600 = vmatpush1.bf16.msra.mxu0 %v1857_v38 }
 0x7ba   :  { %1602 = vmatprep.subr.bf16.mxu0 %v1859_v39 }
 0x7bd   :  { %1604 = vmatpush1.bf16.msra.mxu0 %v1878_v45 }
 0x7be   :  { %1606 = vmatprep.subr.bf16.mxu0 %v1881_v46 }
 0x7c1   :  { %1608 = vmatpush1.bf16.msra.mxu0 %v1897_v50 }
 0x7c2   :  { %1610 = vmatprep.subr.bf16.mxu0 %v1824_v24 }
 0x819   :  { %v797_v62 = vpop.permute.xlu1 %796 }
 0x887   :  { %v782_v57 = vpop.f32.mrb[4].mxu0 }
 0x888   :  { %v783_v47 = vadd.f32 %v782_v57, %v193_v43  ;;  %v784_v58 = vpop.f32.mrb[5].mxu0 }
 0x889   :  { %v785_v48 = vadd.f32 %v784_v58, %v195_v44 }
 0x88a   :  { %v787_v49 = vmul.f32 0.5, %v783_v47  ;;  %v2129_v47 = vld [vmem:[%s2282_s1 + $0x28] sm:$0xff] }
 0x88b   :  { %v788_v51 = vmul.f32 %v785_v48, %v1981_v18  ;;  %vm925_vm9 = vcmp.gt.f32.partialorder %v2129_v47, 0.5 }
 0x88c   :  { %1716 = vtanh.f32 %v787_v49 }
 0x88d   :  { %1718 = vtanh.f32 %v788_v51 }
 0x896   :  { %v1717_v52 = vpop.eup %1716 }
 0x897   :  { %v1719_v53 = vpop.eup %1718  ;;  %v791_v55 = vmul.f32 0.5, %v1717_v52  ;;  %v205_v52 = vadd.f32 %v1965_v5, %v1976_v13 }
 0x898   :  { %v792_v56 = vmul.f32 %v1719_v53, %v1981_v18 }
 0x899   :  { %v793_v63 = vadd.f32 0.5, %v791_v55 }
 0x89a   :  { %v794_v61 = vadd.f32 %v792_v56, %v1985_v26 }
 0x89b   :  { %v799_v4 = vmul.f32 %v797_v62, %v793_v63 }
 0x89c   :  { %v800_v2 = vmul.f32 %v794_v61, %v793_v63 }
 0x89e   :  { %802 = vrot.lane.b32.xlu0 %v800_v2, %s1742_s18 }
 0x910   :  { %v803_v7 = vpop.permute.xlu0 %802 }
 0x911   :  { %v805_v8 = vadd.f32 %v803_v7, %v799_v4 }
 0x913   :  { %1720 = vtanh.f32 %v805_v8  ;;  %812 = vrot.lane.b32.xlu0 %v805_v8, %s1742_s18 }
 0x91d   :  { %v1721_v9 = vpop.eup %1720 }
 0x91e   :  { %v807_v10 = vmul.f32 %v1721_v9, %v794_v61  ;;  %v1442_v9 = vld [vmem:[%s2282_s1 + $0x30] sm:$0xff] }
 0x91f   :  { %vm1040_vm10 = vcmp.gt.f32.partialorder %v1442_v9, 0.5 }
 0x920   :  { %817 = vrot.lane.b32.xlu1 %v807_v10, %s1742_s18 }
 0x985   :  { %v813_v16 = vpop.permute.xlu0 %812 }
 0x986   :  { %v815_v17 = vsel %vm810_vm8, %v813_v16, %v698_v37 }
 0x987   :  { %911 = vrot.lane.b32.xlu1 %v815_v17, %s1742_s18 }
 0x992   :  { %v818_v19 = vpop.permute.xlu1 %817 }
 0x993   :  { %v820_v21 = vsel %vm810_vm8, %v818_v19, %v703_v42  ;;  %821 = vst.msk [vmem:[#allocation3 + $0x20] sm:$0xff] %vm352_vm3, %v818_v19 }
 0x994   :  { %822 = vst.msk [vmem:[#allocation3 + $0x18] sm:$0xff] %vm355_vm4, %v818_v19  ;;  %1439 = vmatmul.mubr.msk.f32.vlgmr.msra.gmra.mrb[6].mxu0 %vm77_vm0, %v820_v21 }
 0x995   :  { %1612 = vmatpush1.bf16.msra.mxu0 %v1832_v28  ;;  %1010 = vmatprep.mubr.f32.mxu0 %v1740_v3 }
 0x996   :  { %1614 = vmatprep.subr.bf16.mxu0 %v1840_v32 }
 0x999   :  { %1616 = vmatpush1.bf16.msra.mxu0 %v1857_v38 }
 0x99a   :  { %1618 = vmatprep.subr.bf16.mxu0 %v1859_v39 }
 0x99d   :  { %1620 = vmatpush1.bf16.msra.mxu0 %v1878_v45 }
 0x99e   :  { %1622 = vmatprep.subr.bf16.mxu0 %v1881_v46 }
 0x9a1   :  { %1624 = vmatpush1.bf16.msra.mxu0 %v1897_v50 }
 0x9a2   :  { %1626 = vmatprep.subr.bf16.mxu0 %v1824_v24 }
 0x9f9   :  { %v912_v1 = vpop.permute.xlu1 %911 }
 0xa67   :  { %v897_v25 = vpop.f32.mrb[6].mxu0 }
 0xa68   :  { %v898_v59 = vadd.f32 %v897_v25, %v199_v22  ;;  %v899_v27 = vpop.f32.mrb[7].mxu0  ;;  %v213_v22 = vadd.f32 %v1974_v12, %v1978_v14  ;;  %v50_v12 = vld [vmem:[%s2280_s2 + $0x110] sm:$0xff] }
 0xa69   :  { %v900_v60 = vadd.f32 %v899_v27, %v201_v23 }
 0xa6a   :  { %v902_v29 = vmul.f32 0.5, %v898_v59 }
 0xa6b   :  { %v903_v30 = vmul.f32 %v900_v60, %v1981_v18 }
 0xa6c   :  { %1722 = vtanh.f32 %v902_v29 }
 0xa6d   :  { %1724 = vtanh.f32 %v903_v30 }
 0xa76   :  { %v1723_v31 = vpop.eup %1722 }
 0xa77   :  { %v1725_v33 = vpop.eup %1724  ;;  %v906_v34 = vmul.f32 0.5, %v1723_v31 }
 0xa78   :  { %v907_v24 = vmul.f32 %v1725_v33, %v1981_v18 }
 0xa79   :  { %v908_v36 = vadd.f32 0.5, %v906_v34 }
 0xa7a   :  { %v909_v0 = vadd.f32 %v907_v24, %v1985_v26 }
 0xa7b   :  { %v914_v40 = vmul.f32 %v912_v1, %v908_v36  ;;  %v54_v1 = vld [vmem:[%s2280_s2 + $0x150] sm:$0xff] }
 0xa7c   :  { %v915_v37 = vmul.f32 %v909_v0, %v908_v36 }
 0xa7e   :  { %917 = vrot.lane.b32.xlu0 %v915_v37, %s1742_s18 }
 0xaf0   :  { %v918_v42 = vpop.permute.xlu0 %917 }
 0xaf1   :  { %v920_v43 = vadd.f32 %v918_v42, %v914_v40  ;;  %v55_v40 = vld [vmem:[%s2280_s2 + $0x160] sm:$0xff] }
 0xaf2   :  { %v1649_v42 = vpack.c.bf16 %v55_v40, %v54_v1 }
 0xaf3   :  { %1726 = vtanh.f32 %v920_v43  ;;  %927 = vrot.lane.b32.xlu0 %v920_v43, %s1742_s18  ;;  %v56_v43 = vld [vmem:[%s2280_s2 + $0x170] sm:$0xff] }
 0xafd   :  { %v1727_v44 = vpop.eup %1726 }
 0xafe   :  { %v922_v57 = vmul.f32 %v1727_v44, %v909_v0  ;;  %v57_v44 = vld [vmem:[%s2280_s2 + $0x180] sm:$0xff] }
 0xb00   :  { %932 = vrot.lane.b32.xlu1 %v922_v57, %s1742_s18  ;;  %v1653_v57 = vpack.c.bf16 %v57_v44, %v56_v43 }
 0xb65   :  { %v928_v58 = vpop.permute.xlu0 %927 }
 0xb66   :  { %v930_v48 = vsel %vm925_vm9, %v928_v58, %v815_v17 }
 0xb67   :  { %1026 = vrot.lane.b32.xlu1 %v930_v48, %s1742_s18 }
 0xb72   :  { %v933_v49 = vpop.permute.xlu1 %932 }
 0xb73   :  { %v935_v51 = vsel %vm925_vm9, %v933_v49, %v820_v21  ;;  %936 = vst.msk [vmem:[#allocation3 + $0x28] sm:$0xff] %vm352_vm3, %v933_v49  ;;  %v211_v21 = vadd.f32 %v1972_v11, %v1976_v13 }
 0xb74   :  { %937 = vst.msk [vmem:[#allocation3 + $0x10] sm:$0xff] %vm355_vm4, %v933_v49  ;;  %1441 = vmatmul.mubr.msk.f32.vlgmr.msra.gmra.mrb[8].mxu0 %vm77_vm0, %v935_v51  ;;  %v1183_v49 = vld [vmem:[%s2282_s1 + $0x38] sm:$0xff] }
 0xb75   :  { %1628 = vmatpush1.bf16.msra.mxu0 %v1832_v28  ;;  %1125 = vmatprep.mubr.f32.mxu0 %v1740_v3  ;;  %v207_v28 = vadd.f32 %v1967_v6, %v1978_v14  ;;  %v51_v14 = vld [vmem:[%s2280_s2 + $0x120] sm:$0xff]  ;;  %vm1155_vm11 = vcmp.gt.f32.partialorder %v1183_v49, 0.5 }
 0xb76   :  { %1630 = vmatprep.subr.bf16.mxu0 %v1840_v32 }
 0xb79   :  { %1632 = vmatpush1.bf16.msra.mxu0 %v1857_v38 }
 0xb7a   :  { %1634 = vmatprep.subr.bf16.mxu0 %v1859_v39 }
 0xb7d   :  { %1636 = vmatpush1.bf16.msra.mxu0 %v1878_v45 }
 0xb7e   :  { %1638 = vmatprep.subr.bf16.mxu0 %v1881_v46 }
 0xb81   :  { %1640 = vmatpush1.bf16.msra.mxu0 %v1897_v50 }
 0xbd9   :  { %v1027_v6 = vpop.permute.xlu1 %1026 }
 0xc47   :  { %v1012_v53 = vpop.f32.mrb[8].mxu0 }
 0xc48   :  { %v1013_v3 = vadd.f32 %v1012_v53, %v205_v52  ;;  %v1014_v55 = vpop.f32.mrb[9].mxu0 }
 0xc49   :  { %v1015_v32 = vadd.f32 %v1014_v55, %v207_v28 }
 0xc4a   :  { %v1017_v56 = vmul.f32 0.5, %v1013_v3 }
 0xc4b   :  { %v1018_v38 = vmul.f32 %v1015_v32, %v1981_v18  ;;  %v1170_v32 = vld [vmem:[#allocation3 + $0x10] sm:$0xff] }
 0xc4c   :  { %1728 = vtanh.f32 %v1017_v56 }
 0xc4d   :  { %1730 = vtanh.f32 %v1018_v38 }
 0xc56   :  { %v1729_v39 = vpop.eup %1728 }
 0xc57   :  { %v1731_v45 = vpop.eup %1730  ;;  %v1021_v46 = vmul.f32 0.5, %v1729_v39 }
 0xc58   :  { %v1022_v50 = vmul.f32 %v1731_v45, %v1981_v18  ;;  %v1171_v45 = vld [vmem:[#allocation3 + $0x18] sm:$0xff] }
 0xc59   :  { %v1023_v63 = vadd.f32 0.5, %v1021_v46 }
 0xc5a   :  { %v1024_v5 = vadd.f32 %v1022_v50, %v1985_v26  ;;  %v1172_v50 = vld [vmem:[#allocation3 + $0x20] sm:$0xff] }
 0xc5b   :  { %v1029_v2 = vmul.f32 %v1027_v6, %v1023_v63  ;;  %v1173_v6 = vld [vmem:[#allocation3 + $0x28] sm:$0xff] }
 0xc5c   :  { %v1030_v61 = vmul.f32 %v1024_v5, %v1023_v63 }
 0xc5e   :  { %1032 = vrot.lane.b32.xlu0 %v1030_v61, %s1742_s18 }
 0xcd0   :  { %v1033_v62 = vpop.permute.xlu0 %1032 }
 0xcd1   :  { %v1035_v4 = vadd.f32 %v1033_v62, %v1029_v2 }
 0xcd3   :  { %1732 = vtanh.f32 %v1035_v4  ;;  %1042 = vrot.lane.b32.xlu0 %v1035_v4, %s1742_s18 }
 0xcdd   :  { %v1733_v7 = vpop.eup %1732 }
 0xcde   :  { %v1037_v8 = vmul.f32 %v1733_v7, %v1024_v5 }
 0xce0   :  { %1047 = vrot.lane.b32.xlu1 %v1037_v8, %s1742_s18 }
 0xd45   :  { %v1043_v10 = vpop.permute.xlu0 %1042 }
 0xd46   :  { %v2157_v16 = vsel %vm1040_vm10, %v1043_v10, %v930_v48 }
 0xd47   :  { %1141 = vrot.lane.b32.xlu1 %v2157_v16, %s1742_s18 }
 0xd52   :  { %v1048_v17 = vpop.permute.xlu1 %1047 }
 0xd53   :  { %v2161_v19 = vsel %vm1040_vm10, %v1048_v17, %v935_v51  ;;  %1051 = vst.msk [vmem:[#allocation3 + $0x30] sm:$0xff] %vm352_vm3, %v1048_v17 }
 0xd54   :  { %1052 = vst.msk [vmem:[#allocation3 + $0x8] sm:$0xff] %vm355_vm4, %v1048_v17  ;;  %1443 = vmatmul.mubr.msk.f32.vlgmr.msra.gmra.mrb[10].mxu0 %vm77_vm0, %v2161_v19 }
 0xd5a   :  { %v1174_v2 = vld [vmem:[#allocation3 + $0x30] sm:$0xff] }
 0xd5b   :  { %v1169_v3 = vld [vmem:[#allocation3 + $0x8] sm:$0xff] }
 0xe27   :  { %v1127_v23 = vpop.f32.mrb[10].mxu0 }
 0xe28   :  { %v1128_v25 = vadd.f32 %v1127_v23, %v211_v21  ;;  %v1129_v59 = vpop.f32.mrb[11].mxu0 }
 0xe29   :  { %v1130_v27 = vadd.f32 %v1129_v59, %v213_v22 }
 0xe2a   :  { %v1132_v60 = vmul.f32 0.5, %v1128_v25 }
 0xe2b   :  { %v1133_v29 = vmul.f32 %v1130_v27, %v1981_v18 }
 0xe2c   :  { %1734 = vtanh.f32 %v1132_v60 }
 0xe2d   :  { %1736 = vtanh.f32 %v1133_v29 }
 0xe36   :  { %v1735_v30 = vpop.eup %1734 }
 0xe37   :  { %v1737_v31 = vpop.eup %1736  ;;  %v1136_v33 = vmul.f32 0.5, %v1735_v30 }
 0xe38   :  { %v1137_v34 = vmul.f32 %v1737_v31, %v1981_v18  ;;  %v52_v18 = vld [vmem:[%s2280_s2 + $0x130] sm:$0xff] }
 0xe39   :  { %v1138_v24 = vadd.f32 0.5, %v1136_v33 }
 0xe3a   :  { %v1139_v11 = vadd.f32 %v1137_v34, %v1985_v26  ;;  %v1641_v26 = vpack.c.bf16 %v51_v14, %v50_v12 }
 0xe3c   :  { %v1145_v13 = vmul.f32 %v1139_v11, %v1138_v24  ;;  %1642 = vmatprep.subr.bf16.mxu1 %v1641_v26 }
 0xe3d   :  { %1644 = vmatpush3.bf16.msra.mxu1 %v1641_v26 }
 0xe3e   :  { %1147 = vrot.lane.b32.xlu0 %v1145_v13, %s1742_s18 }
 0xe42   :  { %1192 = vrot.lane.b32.xlu0 %v1995_v41, %s1742_s18  ;;  %v53_v41 = vld [vmem:[%s2280_s2 + $0x140] sm:$0xff] }
 0xe46   :  { %1196 = vrot.lane.b32.xlu0 %v2042_v54, %s1742_s18  ;;  %v1645_v54 = vpack.c.bf16 %v53_v41, %v52_v18 }
 0xe48   :  { %1646 = vmatprep.subr.bf16.mxu1 %v1645_v54 }
 0xe49   :  { %1648 = vmatpush3.bf16.msra.mxu1 %v1645_v54 }
 0xe4a   :  { %1200 = vrot.lane.b32.xlu0 %v2100_v15, %s1742_s18  ;;  %v1142_v15 = vpop.permute.xlu1 %1141  ;;  %1650 = vmatprep.subr.bf16.mxu1 %v1649_v42 }
 0xe4b   :  { %v1144_v36 = vmul.f32 %v1142_v15, %v1138_v24 }
 0xe4d   :  { %1652 = vmatpush3.bf16.msra.mxu1 %v1649_v42 }
 0xe4e   :  { %1204 = vrot.lane.b32.xlu0 %v1442_v9, %s1742_s18  ;;  %1654 = vmatprep.subr.bf16.mxu1 %v1653_v57 }
 0xe51   :  { %1656 = vmatpush3.bf16.msra.mxu1 %v1653_v57 }
 0xeb0   :  { %v1148_v0 = vpop.permute.xlu0 %1147 }
 0xeb1   :  { %v1150_v37 = vadd.f32 %v1148_v0, %v1144_v36 }
 0xeb3   :  { %1738 = vtanh.f32 %v1150_v37  ;;  %1157 = vrot.lane.b32.xlu0 %v1150_v37, %s1742_s18 }
 0xeb4   :  { %v1193_v51 = vpop.permute.xlu0 %1192 }
 0xebd   :  { %v1739_v58 = vpop.eup %1738 }
 0xebe   :  { %v1152_v48 = vmul.f32 %v1739_v58, %v1139_v11 }
 0xec0   :  { %1162 = vrot.lane.b32.xlu1 %v1152_v48, %s1742_s18 }
 0xec4   :  { %1194 = vrot.lane.b32.xlu1 %v2013_v20, %s1742_s18  ;;  %v1197_v20 = vpop.permute.xlu0 %1196 }
 0xec5   :  { %v1218_v39 = vmul.f32 %v1197_v20, %v1170_v32 }
 0xec8   :  { %1198 = vrot.lane.b32.xlu1 %v2071_v35, %s1742_s18  ;;  %v1201_v56 = vpop.permute.xlu0 %1200 }
 0xec9   :  { %v1220_v5 = vmul.f32 %v1201_v56, %v1172_v50 }
 0xecc   :  { %1202 = vrot.lane.b32.xlu1 %v2129_v47, %s1742_s18  ;;  %v1205_v61 = vpop.permute.xlu0 %1204 }
 0xecd   :  { %v1222_v4 = vmul.f32 %v1205_v61, %v1174_v2 }
 0xed0   :  { %1206 = vrot.lane.b32.xlu1 %v1183_v49, %s1742_s18 }
 0xf25   :  { %v1158_v27 = vpop.permute.xlu0 %1157 }
 0xf26   :  { %v1160_v60 = vsel %vm1155_vm11, %v1158_v27, %v2157_v16 }
 0xf32   :  { %v1163_v52 = vpop.permute.xlu1 %1162 }
 0xf33   :  { %v2220_v28 = vsel %vm1155_vm11, %v1163_v52, %v2161_v19  ;;  %1166 = vst.msk [vmem:[#allocation3 + $0x38] sm:$0xff] %vm352_vm3, %v1163_v52 }
 0xf34   :  { %1167 = vst.msk [vmem:[#allocation3] sm:$0xff] %vm355_vm4, %v1163_v52 }
 0xf36   :  { %v1195_v35 = vpop.permute.xlu1 %1194 }
 0xf37   :  { %v1217_v38 = vmul.f32 %v1195_v35, %v1169_v3 }
 0xf3a   :  { %v1199_v47 = vpop.permute.xlu1 %1198  ;;  %v1175_v8 = vld [vmem:[#allocation3 + $0x38] sm:$0xff] }
 0xf3b   :  { %v1168_v53 = vld [vmem:[#allocation3] sm:$0xff]  ;;  %v1219_v63 = vmul.f32 %v1199_v47, %v1171_v45 }
 0xf3c   :  { %v1216_v55 = vmul.f32 %v1193_v51, %v1168_v53 }
 0xf3e   :  { %1485 = vmatprep.mubr.msk.f32.mxu1 %vm77_vm0, %v1216_v55  ;;  %v1203_v46 = vpop.permute.xlu1 %1202 }
 0xf3f   :  { %1486 = vmatmul.mubr.msk.f32.vlgmr.msra.gmra.mrb[16].mxu1 %vm77_vm0, %v1217_v38  ;;  %v1221_v62 = vmul.f32 %v1203_v46, %v1173_v6 }
 0xf40   :  { %1488 = vmatprep.mubr.msk.f32.mxu1 %vm77_vm0, %v1218_v39 }
 0xf42   :  { %v1207_v7 = vpop.permute.xlu1 %1206 }
 0xf43   :  { %1489 = vmatmul.mubr.msk.f32.gmra.mrb[18].mxu1 %vm77_vm0, %v1219_v63  ;;  %v1223_v9 = vmul.f32 %v1207_v7, %v1175_v8 }
 0xf44   :  { %1491 = vmatprep.mubr.msk.f32.mxu1 %vm77_vm0, %v1220_v5 }
 0xf47   :  { %1492 = vmatmul.mubr.msk.f32.gmra.mrb[20].mxu1 %vm77_vm0, %v1221_v62 }
 0xf48   :  { %1494 = vmatprep.mubr.msk.f32.mxu1 %vm77_vm0, %v1222_v4 }
 0xf4b   :  { %1495 = vmatmul.mubr.msk.f32.gmra.mrb[22].mxu1 %vm77_vm0, %v1223_v9 }
0x1012   :  { %v1487_v10 = vpop.f32.mrb[16].mxu1 }
0x1013   :  { %1363 = vrot.lane.b32.xlu0 %v1487_v10, %s1742_s18  ;;  %v1314_v17 = vpop.f32.mrb[17].mxu1 }
0x1014   :  { %1361 = vrot.lane.b32.xlu1 %v1314_v17, %s1742_s18 }
0x1016   :  { %v1490_v19 = vpop.f32.mrb[18].mxu1 }
0x1017   :  { %1367 = vrot.lane.b32.xlu0 %v1490_v19, %s1742_s18  ;;  %v1324_v21 = vpop.f32.mrb[19].mxu1 }
0x1018   :  { %1365 = vrot.lane.b32.xlu1 %v1324_v21, %s1742_s18 }
0x101a   :  { %v1493_v22 = vpop.f32.mrb[20].mxu1 }
0x101b   :  { %1371 = vrot.lane.b32.xlu0 %v1493_v22, %s1742_s18  ;;  %v1334_v23 = vpop.f32.mrb[21].mxu1 }
0x101c   :  { %1369 = vrot.lane.b32.xlu1 %v1334_v23, %s1742_s18 }
0x101e   :  { %v1496_v25 = vpop.f32.mrb[22].mxu1 }
0x101f   :  { %1375 = vrot.lane.b32.xlu0 %v1496_v25, %s1742_s18  ;;  %v1344_v59 = vpop.f32.mrb[23].mxu1 }
0x1020   :  { %1373 = vrot.lane.b32.xlu1 %v1344_v59, %s1742_s18 }
0x1024   :  { %1402 = vrot.lane.b32.xlu1 %v1160_v60, %s1742_s18 }
0x1085   :  { %v1364_v29 = vpop.permute.xlu0 %1363 }
0x1086   :  { %v1386_v30 = vsel %vm77_vm0, %v1217_v38, %v1364_v29  ;;  %v1362_v31 = vpop.permute.xlu1 %1361 }
0x1087   :  { %1394 = vst [vmem:[%s2283_s3 + $0x8] sm:$0xff] %v1386_v30  ;;  %v1385_v33 = vsel %vm77_vm0, %v1216_v55, %v1362_v31 }
0x1088   :  { %1393 = vst [vmem:[%s2283_s3] sm:$0xff] %v1385_v33 }
0x1089   :  { %v1368_v34 = vpop.permute.xlu0 %1367 }
0x108a   :  { %v1388_v24 = vsel %vm77_vm0, %v1219_v63, %v1368_v34  ;;  %v1366_v16 = vpop.permute.xlu1 %1365 }
0x108b   :  { %1396 = vst [vmem:[%s2283_s3 + $0x18] sm:$0xff] %v1388_v24  ;;  %v1387_v11 = vsel %vm77_vm0, %v1218_v39, %v1366_v16 }
0x108c   :  { %1395 = vst [vmem:[%s2283_s3 + $0x10] sm:$0xff] %v1387_v11 }
0x108d   :  { %v1372_v13 = vpop.permute.xlu0 %1371 }
0x108e   :  { %v1390_v12 = vsel %vm77_vm0, %v1221_v62, %v1372_v13  ;;  %v1370_v14 = vpop.permute.xlu1 %1369 }
0x108f   :  { %1398 = vst [vmem:[%s2283_s3 + $0x28] sm:$0xff] %v1390_v12  ;;  %v1389_v18 = vsel %vm77_vm0, %v1220_v5, %v1370_v14 }
0x1090   :  { %1397 = vst [vmem:[%s2283_s3 + $0x20] sm:$0xff] %v1389_v18 }
0x1091   :  { %v1376_v26 = vpop.permute.xlu0 %1375 }
0x1092   :  { %v1392_v41 = vsel %vm77_vm0, %v1223_v9, %v1376_v26  ;;  %v1374_v54 = vpop.permute.xlu1 %1373 }
0x1093   :  { %1400 = vst [vmem:[%s2283_s3 + $0x38] sm:$0xff] %v1392_v41  ;;  %v1391_v15 = vsel %vm77_vm0, %v1222_v4, %v1374_v54 }
0x1094   :  { %1399 = vst [vmem:[%s2283_s3 + $0x30] sm:$0xff] %v1391_v15 }
0x1096   :  { %v1403_v36 = vpop.permute.xlu1 %1402 }
0x1097   :  { %v1405_v0 = vsel %vm77_vm0, %v2220_v28, %v1403_v36 }
0x1098   :  { %1406 = vst [vmem:[%s2284_s4] sm:$0xff] %v1405_v0 }

</bundles_post_ra>
